<compile_context>
chip_gen: v5e
topology: v5e:2x2
jax: 0.10.0
libtpu: 0.0.40
codegen_flags: <defaults>
</compile_context>

<pallas_src>
import functools

import jax
import jax.numpy as jnp
from jax import lax
from jax.experimental import pallas as pl
from jax.experimental.pallas import tpu as pltpu


def _inv_std_normal_cdf(u):
    """Acklam's rational approximation of the standard normal inverse CDF.

    Uses only +,*,/ and comparisons plus log and sqrt (no trig), so it lowers
    cleanly on both the Mosaic TPU backend and the Pallas interpreter.
    Absolute error < ~1.2e-9 in f64; evaluated here in f32.
    """
    a1, a2, a3 = -3.969683028665376e+01, 2.209460984245205e+02, -2.759285104469687e+02
    a4, a5, a6 = 1.383577518672690e+02, -3.066479806614716e+01, 2.506628277459239e+00
    b1, b2, b3 = -5.447609879822406e+01, 1.615858368580409e+02, -1.556989798598866e+02
    b4, b5 = 6.680131188771972e+01, -1.328068155288572e+01
    c1, c2, c3 = -7.784894002430293e-03, -3.223964580411365e-01, -2.400758277161838e+00
    c4, c5, c6 = -2.549732539343734e+00, 4.374664141464968e+00, 2.938163982698783e+00
    d1, d2 = 7.784695709041462e-03, 3.224671290700398e-01
    d3, d4 = 2.445134137142996e+00, 3.754408661907416e+00
    p_low = 0.02425

    # Central region.
    q = u - 0.5
    r = q * q
    num_c = ((((a1 * r + a2) * r + a3) * r + a4) * r + a5) * r + a6
    den_c = ((((b1 * r + b2) * r + b3) * r + b4) * r + b5) * r + 1.0
    x_central = num_c * q / den_c

    # Both tails, folded by symmetry: t = min(u, 1-u) is always in (0, 0.5],
    # so the log/sqrt are finite for every lane (safe under jnp.where).
    t = jnp.minimum(u, 1.0 - u)
    s = jnp.sqrt(-2.0 * jnp.log(t))
    num_t = ((((c1 * s + c2) * s + c3) * s + c4) * s + c5) * s + c6
    den_t = (((d1 * s + d2) * s + d3) * s + d4) * s + 1.0
    ratio = num_t / den_t                      # negative (lower-tail value)
    x_tail = jnp.where(u < 0.5, ratio, -ratio)

    return jnp.where(t < p_low, x_tail, x_central)


def _gaussian_noise_kernel(seed_ref, x_ref, o_ref, *, sigma, tile_rows, lane):
    shape = x_ref.shape  # (tile_rows, lane)

    # --- counter-based PRNG: one uniform per element -------------------------
    # Global element index (uint32 counter) for every element of this tile;
    # mixing in program_id guarantees distinct noise per grid step.
    row = lax.broadcasted_iota(jnp.int32, shape, 0).astype(jnp.uint32)
    col = lax.broadcasted_iota(jnp.int32, shape, 1).astype(jnp.uint32)
    base_row = (pl.program_id(0) * tile_rows).astype(jnp.uint32)
    idx = (base_row + row) * jnp.uint32(lane) + col

    seed = seed_ref[0].astype(jnp.uint32)
    # SplitMix-style: Weyl step on the counter keyed by the seed, then the
    # murmur3 fmix32 finalizer for avalanche.  Pure VPU work (xor/shift/mul).
    t = (idx * jnp.uint32(0x9E3779B9)
         + seed * jnp.uint32(0x85EBCA6B)
         + jnp.uint32(0x6A09E667))
    t = t ^ (t >> jnp.uint32(16))
    t = t * jnp.uint32(0x85EBCA6B)
    t = t ^ (t >> jnp.uint32(13))
    t = t * jnp.uint32(0xC2B2AE35)
    bits = t ^ (t >> jnp.uint32(16))

    # 23 random bits -> uniform strictly inside (0, 1) so log() is finite.
    mant = (bits >> jnp.uint32(9)).astype(jnp.int32).astype(jnp.float32)
    u = (mant + 0.5) * jnp.float32(1.0 / 8388608.0)

    # --- uniform -> standard normal -> add scaled noise ----------------------
    z = _inv_std_normal_cdf(u)

    x = x_ref[...]
    if x.dtype != jnp.float32:        # hoisted: no redundant casts for f32 inputs
        x = x.astype(jnp.float32)
    o_ref[...] = (x + jnp.float32(sigma) * z).astype(o_ref.dtype)


def gaussian_noise(x, sigma, seed, training=True):
    """Pallas implementation of GaussianNoise.forward.

    x:        any-shape array (NCHW in the demo)
    sigma:    python float, noise std
    seed:     int32 scalar; pass a fresh value each call for fresh noise
              (PyTorch draws new noise every forward from global RNG state).
    training: if False, returns x unchanged.
    """
    if not training:
        return x

    orig_shape = x.shape
    n = x.size

    LANE = 1024          # wide, lane-dense tiles (multiple of 128)
    MAX_TILE_ROWS = 256  # (256, 1024) f32 block = 1 MiB -> ~4 MiB double-buffered I/O

    flat = x.reshape(-1)
    pad = (-n) % LANE
    if pad:
        # TODO(synk): ragged tail path costs one extra copy; typical conv
        # activations (N*C*H*W multiple of 1024) never hit it.
        flat = jnp.pad(flat, (0, pad))
    total = n + pad
    rows = total // LANE

    if rows <= MAX_TILE_ROWS:
        tile_rows = rows          # single block == full row extent (no (8,·) constraint)
    else:
        tile_rows = MAX_TILE_ROWS  # multiple of 8; last block may be partial (masked)

    x2 = flat.reshape(rows, LANE)
    grid = (pl.cdiv(rows, tile_rows),)
    seed_arr = jnp.asarray([seed], dtype=jnp.int32)

    kernel = functools.partial(
        _gaussian_noise_kernel,
        sigma=float(sigma), tile_rows=tile_rows, lane=LANE)

    out = pl.pallas_call(
        kernel,
        out_shape=jax.ShapeDtypeStruct((rows, LANE), x.dtype),
        grid_spec=pltpu.PrefetchScalarGridSpec(
            num_scalar_prefetch=1,          # seed lives in SMEM
            grid=grid,
            in_specs=[pl.BlockSpec((tile_rows, LANE), lambda i, seed_ref: (i, 0))],
            out_specs=pl.BlockSpec((tile_rows, LANE), lambda i, seed_ref: (i, 0)),
        ),
        compiler_params=pltpu.CompilerParams(
            dimension_semantics=("parallel",),      # use both TCs on v7x
            vmem_limit_bytes=32 * 1024 * 1024,      # headroom; safe on all gens
        ),
    )(seed_arr, x2)

    out_flat = out.reshape(-1)
    if pad:
        out_flat = out_flat[:n]
    return out_flat.reshape(orig_shape)


if __name__ == "__main__":
    key = jax.random.PRNGKey(0)
    # NCHW, matching PyTorch conv conventions: batch=2, channels=4, spatial=16.
    x = jax.random.normal(key, (2, 4, 16, 16), dtype=jnp.float32)
    sigma = 0.1

    # Training mode: x + sigma * N(0, 1)
    y = gaussian_noise(x, sigma=sigma, seed=0, training=True)
    y = jax.block_until_ready(y)
    assert y.shape == x.shape and y.dtype == x.dtype

    noise = y - x
    assert bool(jnp.any(jnp.abs(noise) > 0.0))            # noise was added
    assert float(jnp.max(jnp.abs(noise))) < 10.0 * sigma  # bounded like N(0, sigma)
    assert abs(float(jnp.mean(noise))) < 0.25 * sigma     # mean ~ 0
    std = float(jnp.std(noise))
    assert 0.7 * sigma < std < 1.3 * sigma                # std ~ sigma

    # Different seed -> different noise.
    y2 = gaussian_noise(x, sigma=sigma, seed=123, training=True)
    y2 = jax.block_until_ready(y2)
    assert bool(jnp.any(jnp.abs(y2 - y) > 0.0))

    # Eval mode: identity.
    y_eval = gaussian_noise(x, sigma=sigma, seed=0, training=False)
    y_eval = jax.block_until_ready(y_eval)
    assert bool(jnp.array_equal(y_eval, x))

    print("KERNEL_OK")
</pallas_src>

<mosaic_0001>
module attributes {stable_mosaic.version = 11 : i64} {
  func.func @_gaussian_noise_kernel(%arg0: i32, %arg1: memref<1xi32, #tpu.memory_space<smem>>, %arg2: memref<2x1024xf32, #tpu.memory_space<vmem>>, %arg3: memref<2x1024xf32, #tpu.memory_space<vmem>>) attributes {dimension_semantics = [#tpu.dimension_semantics<parallel>], iteration_bounds = array<i64: 1>, scalar_prefetch = 1 : i64, scratch_operands = 0 : i64, tpu.core_type = #tpu.core_type<tc>, window_params = [{transform_indices = @transform_0, window_bounds = array<i64: 2, 1024>}, {transform_indices = @transform_1, window_bounds = array<i64: 2, 1024>}]} {
    %0 = tpu.iota {dimensions = array<i32: 0>} : vector<2x1024xi32>
    %1 = tpu.iota {dimensions = array<i32: 1>} : vector<2x1024xi32>
    %c2_i32 = arith.constant 2 : i32
    %2 = arith.muli %arg0, %c2_i32 : i32
    %3 = vector.broadcast %2 : i32 to vector<2x1024xi32>
    %4 = arith.addi %3, %0 : vector<2x1024xi32>
    %c1024_i32 = arith.constant 1024 : i32
    %5 = vector.broadcast %c1024_i32 : i32 to vector<2x1024xi32>
    %6 = arith.muli %4, %5 : vector<2x1024xi32>
    %7 = arith.addi %6, %1 : vector<2x1024xi32>
    %c0 = arith.constant 0 : index
    %8 = memref.load %arg1[%c0] : memref<1xi32, #tpu.memory_space<smem>>
    %c-1640531527_i32 = arith.constant -1640531527 : i32
    %9 = vector.broadcast %c-1640531527_i32 : i32 to vector<2x1024xi32>
    %10 = arith.muli %7, %9 : vector<2x1024xi32>
    %c-2048144789_i32 = arith.constant -2048144789 : i32
    %11 = arith.muli %8, %c-2048144789_i32 : i32
    %12 = vector.broadcast %11 : i32 to vector<2x1024xi32>
    %13 = arith.addi %10, %12 : vector<2x1024xi32>
    %c1779033703_i32 = arith.constant 1779033703 : i32
    %14 = vector.broadcast %c1779033703_i32 : i32 to vector<2x1024xi32>
    %15 = arith.addi %13, %14 : vector<2x1024xi32>
    %c16_i32 = arith.constant 16 : i32
    %16 = vector.broadcast %c16_i32 : i32 to vector<2x1024xi32>
    %17 = arith.shrui %15, %16 : vector<2x1024xi32>
    %18 = arith.xori %15, %17 : vector<2x1024xi32>
    %c-2048144789_i32_0 = arith.constant -2048144789 : i32
    %19 = vector.broadcast %c-2048144789_i32_0 : i32 to vector<2x1024xi32>
    %20 = arith.muli %18, %19 : vector<2x1024xi32>
    %c13_i32 = arith.constant 13 : i32
    %21 = vector.broadcast %c13_i32 : i32 to vector<2x1024xi32>
    %22 = arith.shrui %20, %21 : vector<2x1024xi32>
    %23 = arith.xori %20, %22 : vector<2x1024xi32>
    %c-1028477387_i32 = arith.constant -1028477387 : i32
    %24 = vector.broadcast %c-1028477387_i32 : i32 to vector<2x1024xi32>
    %25 = arith.muli %23, %24 : vector<2x1024xi32>
    %c16_i32_1 = arith.constant 16 : i32
    %26 = vector.broadcast %c16_i32_1 : i32 to vector<2x1024xi32>
    %27 = arith.shrui %25, %26 : vector<2x1024xi32>
    %28 = arith.xori %25, %27 : vector<2x1024xi32>
    %c9_i32 = arith.constant 9 : i32
    %29 = vector.broadcast %c9_i32 : i32 to vector<2x1024xi32>
    %30 = arith.shrui %28, %29 : vector<2x1024xi32>
    %31 = arith.sitofp %30 : vector<2x1024xi32> to vector<2x1024xf32>
    %cst = arith.constant 5.000000e-01 : f32
    %32 = vector.broadcast %cst : f32 to vector<2x1024xf32>
    %33 = arith.addf %31, %32 : vector<2x1024xf32>
    %cst_2 = arith.constant 1.1920929E-7 : f32
    %34 = vector.broadcast %cst_2 : f32 to vector<2x1024xf32>
    %35 = arith.mulf %33, %34 : vector<2x1024xf32>
    %cst_3 = arith.constant 5.000000e-01 : f32
    %36 = vector.broadcast %cst_3 : f32 to vector<2x1024xf32>
    %37 = arith.subf %35, %36 : vector<2x1024xf32>
    %38 = arith.mulf %37, %37 : vector<2x1024xf32>
    %cst_4 = arith.constant -39.6968307 : f32
    %39 = vector.broadcast %cst_4 : f32 to vector<2x1024xf32>
    %40 = arith.mulf %39, %38 : vector<2x1024xf32>
    %cst_5 = arith.constant 220.946106 : f32
    %41 = vector.broadcast %cst_5 : f32 to vector<2x1024xf32>
    %42 = arith.addf %40, %41 : vector<2x1024xf32>
    %43 = arith.mulf %42, %38 : vector<2x1024xf32>
    %cst_6 = arith.constant -275.928497 : f32
    %44 = vector.broadcast %cst_6 : f32 to vector<2x1024xf32>
    %45 = arith.addf %43, %44 : vector<2x1024xf32>
    %46 = arith.mulf %45, %38 : vector<2x1024xf32>
    %cst_7 = arith.constant 138.357758 : f32
    %47 = vector.broadcast %cst_7 : f32 to vector<2x1024xf32>
    %48 = arith.addf %46, %47 : vector<2x1024xf32>
    %49 = arith.mulf %48, %38 : vector<2x1024xf32>
    %cst_8 = arith.constant -30.6647987 : f32
    %50 = vector.broadcast %cst_8 : f32 to vector<2x1024xf32>
    %51 = arith.addf %49, %50 : vector<2x1024xf32>
    %52 = arith.mulf %51, %38 : vector<2x1024xf32>
    %cst_9 = arith.constant 2.50662827 : f32
    %53 = vector.broadcast %cst_9 : f32 to vector<2x1024xf32>
    %54 = arith.addf %52, %53 : vector<2x1024xf32>
    %cst_10 = arith.constant -54.4760971 : f32
    %55 = vector.broadcast %cst_10 : f32 to vector<2x1024xf32>
    %56 = arith.mulf %55, %38 : vector<2x1024xf32>
    %cst_11 = arith.constant 161.585831 : f32
    %57 = vector.broadcast %cst_11 : f32 to vector<2x1024xf32>
    %58 = arith.addf %56, %57 : vector<2x1024xf32>
    %59 = arith.mulf %58, %38 : vector<2x1024xf32>
    %cst_12 = arith.constant -155.698975 : f32
    %60 = vector.broadcast %cst_12 : f32 to vector<2x1024xf32>
    %61 = arith.addf %59, %60 : vector<2x1024xf32>
    %62 = arith.mulf %61, %38 : vector<2x1024xf32>
    %cst_13 = arith.constant 66.8013153 : f32
    %63 = vector.broadcast %cst_13 : f32 to vector<2x1024xf32>
    %64 = arith.addf %62, %63 : vector<2x1024xf32>
    %65 = arith.mulf %64, %38 : vector<2x1024xf32>
    %cst_14 = arith.constant -13.2806816 : f32
    %66 = vector.broadcast %cst_14 : f32 to vector<2x1024xf32>
    %67 = arith.addf %65, %66 : vector<2x1024xf32>
    %68 = arith.mulf %67, %38 : vector<2x1024xf32>
    %cst_15 = arith.constant 1.000000e+00 : f32
    %69 = vector.broadcast %cst_15 : f32 to vector<2x1024xf32>
    %70 = arith.addf %68, %69 : vector<2x1024xf32>
    %71 = arith.mulf %54, %37 : vector<2x1024xf32>
    %72 = arith.divf %71, %70 : vector<2x1024xf32>
    %cst_16 = arith.constant 1.000000e+00 : f32
    %73 = vector.broadcast %cst_16 : f32 to vector<2x1024xf32>
    %74 = arith.subf %73, %35 : vector<2x1024xf32>
    %75 = arith.minimumf %35, %74 : vector<2x1024xf32>
    %76 = math.log %75 : vector<2x1024xf32>
    %cst_17 = arith.constant -2.000000e+00 : f32
    %77 = vector.broadcast %cst_17 : f32 to vector<2x1024xf32>
    %78 = arith.mulf %77, %76 : vector<2x1024xf32>
    %79 = math.sqrt %78 : vector<2x1024xf32>
    %cst_18 = arith.constant -0.0077848942 : f32
    %80 = vector.broadcast %cst_18 : f32 to vector<2x1024xf32>
    %81 = arith.mulf %80, %79 : vector<2x1024xf32>
    %cst_19 = arith.constant -0.322396457 : f32
    %82 = vector.broadcast %cst_19 : f32 to vector<2x1024xf32>
    %83 = arith.addf %81, %82 : vector<2x1024xf32>
    %84 = arith.mulf %83, %79 : vector<2x1024xf32>
    %cst_20 = arith.constant -2.40075827 : f32
    %85 = vector.broadcast %cst_20 : f32 to vector<2x1024xf32>
    %86 = arith.addf %84, %85 : vector<2x1024xf32>
    %87 = arith.mulf %86, %79 : vector<2x1024xf32>
    %cst_21 = arith.constant -2.54973245 : f32
    %88 = vector.broadcast %cst_21 : f32 to vector<2x1024xf32>
    %89 = arith.addf %87, %88 : vector<2x1024xf32>
    %90 = arith.mulf %89, %79 : vector<2x1024xf32>
    %cst_22 = arith.constant 4.37466431 : f32
    %91 = vector.broadcast %cst_22 : f32 to vector<2x1024xf32>
    %92 = arith.addf %90, %91 : vector<2x1024xf32>
    %93 = arith.mulf %92, %79 : vector<2x1024xf32>
    %cst_23 = arith.constant 2.938164 : f32
    %94 = vector.broadcast %cst_23 : f32 to vector<2x1024xf32>
    %95 = arith.addf %93, %94 : vector<2x1024xf32>
    %cst_24 = arith.constant 0.00778469583 : f32
    %96 = vector.broadcast %cst_24 : f32 to vector<2x1024xf32>
    %97 = arith.mulf %96, %79 : vector<2x1024xf32>
    %cst_25 = arith.constant 0.322467119 : f32
    %98 = vector.broadcast %cst_25 : f32 to vector<2x1024xf32>
    %99 = arith.addf %97, %98 : vector<2x1024xf32>
    %100 = arith.mulf %99, %79 : vector<2x1024xf32>
    %cst_26 = arith.constant 2.44513416 : f32
    %101 = vector.broadcast %cst_26 : f32 to vector<2x1024xf32>
    %102 = arith.addf %100, %101 : vector<2x1024xf32>
    %103 = arith.mulf %102, %79 : vector<2x1024xf32>
    %cst_27 = arith.constant 3.7544086 : f32
    %104 = vector.broadcast %cst_27 : f32 to vector<2x1024xf32>
    %105 = arith.addf %103, %104 : vector<2x1024xf32>
    %106 = arith.mulf %105, %79 : vector<2x1024xf32>
    %cst_28 = arith.constant 1.000000e+00 : f32
    %107 = vector.broadcast %cst_28 : f32 to vector<2x1024xf32>
    %108 = arith.addf %106, %107 : vector<2x1024xf32>
    %109 = arith.divf %95, %108 : vector<2x1024xf32>
    %cst_29 = arith.constant 5.000000e-01 : f32
    %110 = vector.broadcast %cst_29 : f32 to vector<2x1024xf32>
    %111 = arith.cmpf olt, %35, %110 : vector<2x1024xf32>
    %cst_30 = arith.constant 0.000000e+00 : f32
    %112 = vector.broadcast %cst_30 : f32 to vector<2x1024xf32>
    %113 = arith.subf %112, %109 : vector<2x1024xf32>
    %114 = arith.select %111, %109, %113 : vector<2x1024xi1>, vector<2x1024xf32>
    %cst_31 = arith.constant 2.425000e-02 : f32
    %115 = vector.broadcast %cst_31 : f32 to vector<2x1024xf32>
    %116 = arith.cmpf olt, %75, %115 : vector<2x1024xf32>
    %117 = arith.select %116, %114, %72 : vector<2x1024xi1>, vector<2x1024xf32>
    %c0_32 = arith.constant 0 : index
    %c0_33 = arith.constant 0 : index
    %118 = vector.load %arg2[%c0_32, %c0_33] : memref<2x1024xf32, #tpu.memory_space<vmem>>, vector<2x1024xf32>
    %cst_34 = arith.constant 1.000000e-01 : f32
    %119 = vector.broadcast %cst_34 : f32 to vector<2x1024xf32>
    %120 = arith.mulf %119, %117 : vector<2x1024xf32>
    %121 = arith.addf %118, %120 : vector<2x1024xf32>
    %c0_35 = arith.constant 0 : index
    %c0_36 = arith.constant 0 : index
    %122 = vector.load %arg3[%c0_35, %c0_36] : memref<2x1024xf32, #tpu.memory_space<vmem>>, vector<2x1024xf32>
    tpu.vector_store %arg3[%c0_35, %c0_36], %121 {strides = array<i32>} : memref<2x1024xf32, #tpu.memory_space<vmem>>, vector<2x1024xf32>,
    return
  }
  func.func @transform_0(%arg0: i32, %arg1: memref<1xi32, #tpu.memory_space<smem>>) -> (i32, i32) {
    %c0_i32 = arith.constant 0 : i32
    %c0_i32_0 = arith.constant 0 : i32
    return %arg0, %c0_i32 : i32, i32
  }
  func.func @transform_1(%arg0: i32, %arg1: memref<1xi32, #tpu.memory_space<smem>>) -> (i32, i32) {
    %c0_i32 = arith.constant 0 : i32
    %c0_i32_0 = arith.constant 0 : i32
    return %arg0, %c0_i32 : i32, i32
  }
}

</mosaic_0001>

<bundles_post_ra>
// kernel: tpu_custom_call.1
= control target key start
LH: loop header
LB: loop body
LE: loop exit
PB: predicated region body
PF: predicated region fallthrough
CT: control target
= control target key end

     0   :  { %8 = vsyncpa [#allocation5], 0  ;;  %s2139_s0 = inlined_call_operand.<no memory space> [shape: s32[1], index: 0, kind: input, shape index: {}]   ;;  %s2140_s1 = inlined_call_operand.hbm [shape: f32[2,1024], index: 1, kind: input, shape index: {}]   ;;  %s2141_s2 = inlined_call_operand.hbm [shape: f32[2,1024], index: 2, kind: output, shape index: {}]  }
   0x1   :  { %9 = vsyncpa [#allocation6], 0  ;;  %s15_s11 = sshll.u32 %s2140_s1, 4  ;;  %s1097_s12 = smov [#allocation4]   ;;  %s16_s11 = int_to_ptr.hbm [resolvable:$true] %s15_s11 }
   0x2   :  { %s17_s13 = sshll.u32 %s1097_s12, 4  ;;  %s18_s13 = int_to_ptr.vmem [resolvable:$true] %s17_s13 }
   0x3   :  { %20 = dma.hbm_to_vmem [thread:$0]  %s16_s11, 256, %s18_s13, [#allocation5]  }
   0x4   :  { %1093 = dma.done.wait [#allocation5], 256  }
   0x5   :  { %1094 = vsyncadd [#allocation5], 4294967040  ;;  %v25_v0 = vlaneseq  ;;  %s57_s16 = smul.u32 2246822507, %s2139_s0  ;;  %s1098_s0 = smov [#allocation7]  }
   0x6   :  { %s959_s1 = sshll.u32 %s1098_s0, 4  ;;  %s961_s19 = sshll.u32 %s2141_s2, 4  ;;  %s960_s1 = int_to_ptr.vmem [resolvable:$true] %s959_s1  ;;  %s962_s19 = int_to_ptr.hbm [resolvable:$true] %s961_s19 }
   0x7   :  { %v26_v1 = vshrl.u32 %v25_v0, 7  ;;  %v28_v2 = vand.u32 127, %v25_v0  ;;  %v58_v11 = vstv %s57_s16 }
   0x9   :  { %v29_v3 = vadd.s32 128, %v28_v2  ;;  %v30_v4 = vadd.s32 256, %v28_v2  ;;  %v31_v5 = vadd.s32 384, %v28_v2  ;;  %v32_v6 = vadd.s32 512, %v28_v2 }
   0xa   :  { %v33_v7 = vadd.s32 640, %v28_v2  ;;  %v34_v8 = vadd.s32 768, %v28_v2  ;;  %v35_v9 = vadd.s32 896, %v28_v2  ;;  %v39_v10 = vmul.u32 1024, %v26_v1 }
   0xc   :  { %v40_v12 = vadd.s32 %v39_v10, %v28_v2  ;;  %v41_v13 = vadd.s32 %v39_v10, %v29_v3  ;;  %v42_v14 = vadd.s32 %v39_v10, %v30_v4  ;;  %v43_v15 = vadd.s32 %v39_v10, %v31_v5 }
   0xd   :  { %v44_v16 = vadd.s32 %v39_v10, %v32_v6  ;;  %v45_v17 = vadd.s32 %v39_v10, %v33_v7  ;;  %v46_v18 = vadd.s32 %v39_v10, %v34_v8  ;;  %v47_v19 = vadd.s32 %v39_v10, %v35_v9 }
   0xe   :  { %v49_v20 = vmul.u32 2654435769, %v40_v12  ;;  %v50_v21 = vmul.u32 2654435769, %v41_v13  ;;  %v51_v22 = vmul.u32 2654435769, %v42_v14 }
   0xf   :  { %v52_v23 = vmul.u32 2654435769, %v43_v15  ;;  %v53_v24 = vmul.u32 2654435769, %v44_v16  ;;  %v54_v25 = vmul.u32 2654435769, %v45_v17 }
  0x10   :  { %v55_v26 = vmul.u32 2654435769, %v46_v18  ;;  %v56_v27 = vmul.u32 2654435769, %v47_v19  ;;  %v59_v28 = vadd.s32 %v58_v11, %v49_v20  ;;  %v60_v29 = vadd.s32 %v58_v11, %v50_v21 }
  0x11   :  { %v61_v30 = vadd.s32 %v58_v11, %v51_v22  ;;  %v62_v31 = vadd.s32 %v58_v11, %v52_v23  ;;  %v63_v32 = vadd.s32 %v58_v11, %v53_v24  ;;  %v64_v33 = vadd.s32 %v58_v11, %v54_v25 }
  0x12   :  { %v65_v34 = vadd.s32 %v58_v11, %v55_v26  ;;  %v66_v35 = vadd.s32 %v58_v11, %v56_v27  ;;  %v67_v36 = vadd.s32 1779033703, %v59_v28  ;;  %v68_v37 = vadd.s32 1779033703, %v60_v29 }
  0x13   :  { %v69_v38 = vadd.s32 1779033703, %v61_v30  ;;  %v70_v39 = vadd.s32 1779033703, %v62_v31  ;;  %v71_v40 = vadd.s32 1779033703, %v63_v32 }
  0x14   :  { %v72_v41 = vadd.s32 1779033703, %v64_v33  ;;  %v73_v42 = vadd.s32 1779033703, %v65_v34  ;;  %v74_v43 = vadd.s32 1779033703, %v66_v35 }
  0x15   :  { %v75_v44 = vshrl.u32 %v67_v36, 16  ;;  %v76_v45 = vshrl.u32 %v68_v37, 16  ;;  %v77_v46 = vshrl.u32 %v69_v38, 16  ;;  %v78_v47 = vshrl.u32 %v70_v39, 16 }
  0x16   :  { %v79_v48 = vshrl.u32 %v71_v40, 16  ;;  %v80_v49 = vshrl.u32 %v72_v41, 16  ;;  %v81_v50 = vshrl.u32 %v73_v42, 16  ;;  %v82_v51 = vshrl.u32 %v74_v43, 16 }
  0x17   :  { %v83_v52 = vxor.u32 %v75_v44, %v67_v36  ;;  %v84_v53 = vxor.u32 %v76_v45, %v68_v37  ;;  %v85_v54 = vxor.u32 %v77_v46, %v69_v38  ;;  %v86_v55 = vxor.u32 %v78_v47, %v70_v39 }
  0x18   :  { %v87_v56 = vxor.u32 %v79_v48, %v71_v40  ;;  %v88_v57 = vxor.u32 %v80_v49, %v72_v41  ;;  %v89_v58 = vxor.u32 %v81_v50, %v73_v42  ;;  %v90_v59 = vxor.u32 %v82_v51, %v74_v43 }
  0x19   :  { %v91_v60 = vmul.u32 2246822507, %v83_v52  ;;  %v92_v61 = vmul.u32 2246822507, %v84_v53  ;;  %v93_v62 = vmul.u32 2246822507, %v85_v54 }
  0x1a   :  { %v94_v63 = vmul.u32 2246822507, %v86_v55  ;;  %v95_v0 = vmul.u32 2246822507, %v87_v56  ;;  %v96_v1 = vmul.u32 2246822507, %v88_v57 }
  0x1b   :  { %v97_v2 = vmul.u32 2246822507, %v89_v58  ;;  %v98_v3 = vmul.u32 2246822507, %v90_v59  ;;  %v99_v4 = vshrl.u32 %v91_v60, 13  ;;  %v100_v5 = vshrl.u32 %v92_v61, 13 }
  0x1c   :  { %v101_v6 = vshrl.u32 %v93_v62, 13  ;;  %v102_v7 = vshrl.u32 %v94_v63, 13  ;;  %v103_v8 = vshrl.u32 %v95_v0, 13  ;;  %v104_v9 = vshrl.u32 %v96_v1, 13 }
  0x1d   :  { %v105_v10 = vshrl.u32 %v97_v2, 13  ;;  %v106_v11 = vshrl.u32 %v98_v3, 13  ;;  %v107_v12 = vxor.u32 %v99_v4, %v91_v60  ;;  %v108_v13 = vxor.u32 %v100_v5, %v92_v61 }
  0x1e   :  { %v109_v14 = vxor.u32 %v101_v6, %v93_v62  ;;  %v110_v15 = vxor.u32 %v102_v7, %v94_v63  ;;  %v111_v16 = vxor.u32 %v103_v8, %v95_v0  ;;  %v112_v17 = vxor.u32 %v104_v9, %v96_v1 }
  0x1f   :  { %v113_v18 = vxor.u32 %v105_v10, %v97_v2  ;;  %v114_v19 = vxor.u32 %v106_v11, %v98_v3  ;;  %v115_v20 = vmul.u32 3266489909, %v107_v12  ;;  %v116_v21 = vmul.u32 3266489909, %v108_v13 }
  0x20   :  { %v117_v22 = vmul.u32 3266489909, %v109_v14  ;;  %v118_v23 = vmul.u32 3266489909, %v110_v15  ;;  %v119_v24 = vmul.u32 3266489909, %v111_v16 }
  0x21   :  { %v120_v25 = vmul.u32 3266489909, %v112_v17  ;;  %v121_v26 = vmul.u32 3266489909, %v113_v18  ;;  %v123_v27 = vshrl.u32 %v115_v20, 16  ;;  %v124_v29 = vshrl.u32 %v116_v21, 16 }
  0x22   :  { %v122_v28 = vmul.u32 3266489909, %v114_v19  ;;  %v125_v30 = vshrl.u32 %v117_v22, 16  ;;  %v126_v31 = vshrl.u32 %v118_v23, 16  ;;  %v127_v32 = vshrl.u32 %v119_v24, 16 }
  0x23   :  { %v128_v33 = vshrl.u32 %v120_v25, 16  ;;  %v131_v34 = vxor.u32 %v123_v27, %v115_v20  ;;  %v129_v35 = vshrl.u32 %v121_v26, 16  ;;  %v132_v37 = vxor.u32 %v124_v29, %v116_v21 }
  0x24   :  { %v130_v36 = vshrl.u32 %v122_v28, 16  ;;  %v133_v38 = vxor.u32 %v125_v30, %v117_v22  ;;  %v134_v39 = vxor.u32 %v126_v31, %v118_v23  ;;  %v135_v40 = vxor.u32 %v127_v32, %v119_v24 }
  0x25   :  { %v136_v41 = vxor.u32 %v128_v33, %v120_v25  ;;  %v139_v42 = vshrl.u32 %v131_v34, 9  ;;  %v137_v43 = vxor.u32 %v129_v35, %v121_v26  ;;  %v140_v45 = vshrl.u32 %v132_v37, 9 }
  0x26   :  { %v138_v44 = vxor.u32 %v130_v36, %v122_v28  ;;  %v141_v46 = vshrl.u32 %v133_v38, 9  ;;  %v142_v47 = vshrl.u32 %v134_v39, 9  ;;  %v143_v48 = vshrl.u32 %v135_v40, 9 }
  0x27   :  { %v144_v49 = vshrl.u32 %v136_v41, 9  ;;  %v147_v50 = vcvt.s32.f32 %v139_v42  ;;  %v145_v51 = vshrl.u32 %v137_v43, 9  ;;  %v148_v53 = vcvt.s32.f32 %v140_v45 }
  0x28   :  { %v146_v52 = vshrl.u32 %v138_v44, 9  ;;  %v149_v54 = vcvt.s32.f32 %v141_v46  ;;  %v150_v55 = vcvt.s32.f32 %v142_v47  ;;  %v151_v56 = vcvt.s32.f32 %v143_v48 }
  0x29   :  { %v152_v57 = vcvt.s32.f32 %v144_v49  ;;  %v155_v58 = vadd.f32 0.5, %v147_v50  ;;  %v153_v59 = vcvt.s32.f32 %v145_v51  ;;  %v156_v61 = vadd.f32 0.5, %v148_v53 }
  0x2a   :  { %v154_v60 = vcvt.s32.f32 %v146_v52  ;;  %v157_v62 = vadd.f32 0.5, %v149_v54  ;;  %v158_v63 = vadd.f32 0.5, %v150_v55  ;;  %v159_v0 = vadd.f32 0.5, %v151_v56 }
  0x2b   :  { %v160_v1 = vadd.f32 0.5, %v152_v57  ;;  %v1120_v2 = vmul.f32 1.1920929e-07, %v155_v58  ;;  %v161_v3 = vadd.f32 0.5, %v153_v59  ;;  %v1122_v5 = vmul.f32 1.1920929e-07, %v156_v61 }
  0x2c   :  { %v162_v4 = vadd.f32 0.5, %v154_v60  ;;  %v1127_v7 = vmul.f32 1.1920929e-07, %v157_v62  ;;  %v1129_v8 = vmul.f32 1.1920929e-07, %v158_v63  ;;  %v1131_v9 = vmul.f32 1.1920929e-07, %v159_v0 }
  0x2d   :  { %2166 = vst [vmem:[#allocation10_spill] sm:$0xff] %v1120_v2  ;;  %v1125_v6 = vadd.f32 -0.5, %v1120_v2  ;;  %v1133_v10 = vmul.f32 1.1920929e-07, %v160_v1  ;;  %v1136_v11 = vadd.f32 -0.5, %v1122_v5  ;;  %v1138_v12 = vmul.f32 1.1920929e-07, %v161_v3 }
  0x2e   :  { %2167 = vst [vmem:[#allocation11_spill] sm:$0xff] %v1122_v5  ;;  %v1141_v13 = vadd.f32 -0.5, %v1127_v7  ;;  %v1144_v14 = vadd.f32 -0.5, %v1129_v8  ;;  %v1146_v15 = vmul.f32 1.1920929e-07, %v162_v4  ;;  %v1149_v16 = vadd.f32 -0.5, %v1131_v9 }
  0x2f   :  { %2168 = vst [vmem:[#allocation12_spill] sm:$0xff] %v1127_v7  ;;  %v1152_v17 = vadd.f32 -0.5, %v1133_v10  ;;  %v1156_v18 = vmul.f32 %v1125_v6, %v1125_v6  ;;  %v1159_v19 = vadd.f32 -0.5, %v1138_v12  ;;  %v1166_v21 = vmul.f32 %v1136_v11, %v1136_v11 }
  0x30   :  { %2169 = vst [vmem:[#allocation13_spill] sm:$0xff] %v1129_v8  ;;  %v1162_v20 = vadd.f32 -0.5, %v1146_v15  ;;  %v1171_v23 = vmul.f32 %v1141_v13, %v1141_v13  ;;  %v1175_v24 = vmul.f32 %v1144_v14, %v1144_v14  ;;  %v1179_v25 = vmul.f32 %v1149_v16, %v1149_v16 }
  0x31   :  { %2170 = vst [vmem:[#allocation14_spill] sm:$0xff] %v1131_v9  ;;  %v187_v22 = vmul.f32 -39.69683, %v1156_v18  ;;  %v1183_v26 = vmul.f32 %v1152_v17, %v1152_v17  ;;  %v188_v27 = vmul.f32 -39.69683, %v1166_v21  ;;  %v1188_v28 = vmul.f32 %v1159_v19, %v1159_v19 }
  0x32   :  { %2171 = vst [vmem:[#allocation15_spill] sm:$0xff] %v1133_v10  ;;  %v189_v29 = vmul.f32 -39.69683, %v1171_v23  ;;  %v190_v30 = vmul.f32 -39.69683, %v1175_v24  ;;  %v1194_v31 = vmul.f32 %v1162_v20, %v1162_v20 }
  0x33   :  { %2172 = vst [vmem:[#allocation16_spill] sm:$0xff] %v1138_v12  ;;  %v191_v32 = vmul.f32 -39.69683, %v1179_v25  ;;  %v192_v33 = vmul.f32 -39.69683, %v1183_v26 }
  0x34   :  { %2173 = vst [vmem:[#allocation17_spill] sm:$0xff] %v1146_v15  ;;  %v195_v34 = vadd.f32 220.9461, %v187_v22  ;;  %v193_v35 = vmul.f32 -39.69683, %v1188_v28 }
  0x35   :  { %v194_v36 = vmul.f32 -39.69683, %v1194_v31  ;;  %v196_v37 = vadd.f32 220.9461, %v188_v27  ;;  %v197_v38 = vadd.f32 220.9461, %v189_v29 }
  0x36   :  { %v198_v39 = vadd.f32 220.9461, %v190_v30  ;;  %v199_v40 = vadd.f32 220.9461, %v191_v32  ;;  %v200_v41 = vadd.f32 220.9461, %v192_v33  ;;  %v203_v42 = vmul.f32 %v195_v34, %v1156_v18 }
  0x37   :  { %v201_v43 = vadd.f32 220.9461, %v193_v35  ;;  %v202_v44 = vadd.f32 220.9461, %v194_v36  ;;  %v204_v45 = vmul.f32 %v196_v37, %v1166_v21  ;;  %v267_v46 = vmul.f32 -54.476097, %v1156_v18 }
  0x38   :  { %v268_v47 = vmul.f32 -54.476097, %v1166_v21  ;;  %v205_v48 = vmul.f32 %v197_v38, %v1171_v23  ;;  %v269_v49 = vmul.f32 -54.476097, %v1171_v23  ;;  %v270_v50 = vmul.f32 -54.476097, %v1175_v24 }
  0x39   :  { %v271_v51 = vmul.f32 -54.476097, %v1179_v25  ;;  %v206_v52 = vmul.f32 %v198_v39, %v1175_v24  ;;  %v207_v53 = vmul.f32 %v199_v40, %v1179_v25  ;;  %v208_v54 = vmul.f32 %v200_v41, %v1183_v26 }
  0x3a   :  { %v211_v55 = vadd.f32 -275.9285, %v203_v42  ;;  %v209_v56 = vmul.f32 %v201_v43, %v1188_v28  ;;  %v275_v57 = vadd.f32 161.58583, %v267_v46  ;;  %v276_v58 = vadd.f32 161.58583, %v268_v47 }
  0x3b   :  { %v277_v59 = vadd.f32 161.58583, %v269_v49  ;;  %v210_v60 = vmul.f32 %v202_v44, %v1194_v31  ;;  %v212_v61 = vadd.f32 -275.9285, %v204_v45  ;;  %v272_v62 = vmul.f32 -54.476097, %v1183_v26 }
  0x3c   :  { %v278_v63 = vadd.f32 161.58583, %v270_v50  ;;  %v273_v0 = vmul.f32 -54.476097, %v1188_v28  ;;  %v279_v1 = vadd.f32 161.58583, %v271_v51  ;;  %v283_v3 = vmul.f32 %v275_v57, %v1156_v18 }
  0x3d   :  { %v284_v4 = vmul.f32 %v276_v58, %v1166_v21  ;;  %v213_v22 = vadd.f32 -275.9285, %v205_v48  ;;  %v214_v27 = vadd.f32 -275.9285, %v206_v52  ;;  %v274_v29 = vmul.f32 -54.476097, %v1194_v31 }
  0x3e   :  { %v285_v30 = vmul.f32 %v277_v59, %v1171_v23  ;;  %v215_v32 = vadd.f32 -275.9285, %v207_v53  ;;  %v286_v33 = vmul.f32 %v278_v63, %v1175_v24  ;;  %v291_v34 = vadd.f32 -155.69897, %v283_v3 }
  0x3f   :  { %v292_v35 = vadd.f32 -155.69897, %v284_v4  ;;  %v216_v36 = vadd.f32 -275.9285, %v208_v54  ;;  %v280_v37 = vadd.f32 161.58583, %v272_v62  ;;  %v287_v41 = vmul.f32 %v279_v1, %v1179_v25 }
  0x40   :  { %v293_v38 = vadd.f32 -155.69897, %v285_v30  ;;  %v217_v39 = vadd.f32 -275.9285, %v209_v56  ;;  %v281_v40 = vadd.f32 161.58583, %v273_v0  ;;  %v299_v42 = vmul.f32 %v291_v34, %v1156_v18 }
  0x41   :  { %v218_v43 = vadd.f32 -275.9285, %v210_v60  ;;  %v219_v44 = vmul.f32 %v211_v55, %v1156_v18  ;;  %v282_v45 = vadd.f32 161.58583, %v274_v29  ;;  %v300_v46 = vmul.f32 %v292_v35, %v1166_v21 }
  0x42   :  { %v220_v47 = vmul.f32 %v212_v61, %v1166_v21  ;;  %v294_v48 = vadd.f32 -155.69897, %v286_v33  ;;  %v301_v49 = vmul.f32 %v293_v38, %v1171_v23  ;;  %v307_v50 = vadd.f32 66.801315, %v299_v42 }
  0x43   :  { %v221_v51 = vmul.f32 %v213_v22, %v1171_v23  ;;  %v222_v52 = vmul.f32 %v214_v27, %v1175_v24  ;;  %v288_v53 = vmul.f32 %v280_v37, %v1183_v26  ;;  %v308_v54 = vadd.f32 66.801315, %v300_v46 }
  0x44   :  { %v223_v56 = vmul.f32 %v215_v32, %v1179_v25  ;;  %v289_v55 = vmul.f32 %v281_v40, %v1188_v28  ;;  %v295_v57 = vadd.f32 -155.69897, %v287_v41  ;;  %v315_v58 = vmul.f32 %v307_v50, %v1156_v18 }
  0x45   :  { %v224_v59 = vmul.f32 %v216_v36, %v1183_v26  ;;  %v225_v60 = vmul.f32 %v217_v39, %v1188_v28  ;;  %v227_v61 = vadd.f32 138.35776, %v219_v44  ;;  %v290_v62 = vmul.f32 %v282_v45, %v1194_v31 }
  0x46   :  { %v226_v63 = vmul.f32 %v218_v43, %v1194_v31  ;;  %v302_v0 = vmul.f32 %v294_v48, %v1175_v24  ;;  %v309_v1 = vadd.f32 66.801315, %v301_v49  ;;  %v323_v3 = vadd.f32 -13.280682, %v315_v58 }
  0x47   :  { %v228_v4 = vadd.f32 138.35776, %v220_v47  ;;  %v229_v22 = vadd.f32 138.35776, %v221_v51  ;;  %v296_v27 = vadd.f32 -155.69897, %v288_v53  ;;  %v316_v29 = vmul.f32 %v308_v54, %v1166_v21 }
  0x48   :  { %v230_v30 = vadd.f32 138.35776, %v222_v52  ;;  %v231_v32 = vadd.f32 138.35776, %v223_v56  ;;  %v297_v33 = vadd.f32 -155.69897, %v289_v55  ;;  %v303_v34 = vmul.f32 %v295_v57, %v1179_v25 }
  0x49   :  { %v232_v35 = vadd.f32 138.35776, %v224_v59  ;;  %v233_v36 = vadd.f32 138.35776, %v225_v60  ;;  %v235_v37 = vmul.f32 %v227_v61, %v1156_v18  ;;  %v298_v38 = vadd.f32 -155.69897, %v290_v62 }
  0x4a   :  { %v234_v39 = vadd.f32 138.35776, %v226_v63  ;;  %v310_v40 = vadd.f32 66.801315, %v302_v0  ;;  %v317_v41 = vmul.f32 %v309_v1, %v1171_v23  ;;  %v331_v42 = vmul.f32 %v323_v3, %v1156_v18 }
  0x4b   :  { %v236_v43 = vmul.f32 %v228_v4, %v1166_v21  ;;  %v237_v44 = vmul.f32 %v229_v22, %v1171_v23  ;;  %v304_v45 = vmul.f32 %v296_v27, %v1183_v26  ;;  %v324_v46 = vadd.f32 -13.280682, %v316_v29 }
  0x4c   :  { %v238_v47 = vmul.f32 %v230_v30, %v1175_v24  ;;  %v239_v48 = vmul.f32 %v231_v32, %v1179_v25  ;;  %v305_v49 = vmul.f32 %v297_v33, %v1188_v28  ;;  %v311_v50 = vadd.f32 66.801315, %v303_v34 }
  0x4d   :  { %v240_v51 = vmul.f32 %v232_v35, %v1183_v26  ;;  %v241_v52 = vmul.f32 %v233_v36, %v1188_v28  ;;  %v243_v53 = vadd.f32 -30.664799, %v235_v37  ;;  %v306_v54 = vmul.f32 %v298_v38, %v1194_v31 }
  0x4e   :  { %v242_v56 = vmul.f32 %v234_v39, %v1194_v31  ;;  %v318_v55 = vmul.f32 %v310_v40, %v1175_v24  ;;  %v325_v57 = vadd.f32 -13.280682, %v317_v41  ;;  %v1253_v58 = vadd.f32 1.0, %v331_v42 }
  0x4f   :  { %v244_v59 = vadd.f32 -30.664799, %v236_v43  ;;  %v245_v60 = vadd.f32 -30.664799, %v237_v44  ;;  %v312_v61 = vadd.f32 66.801315, %v304_v45  ;;  %v332_v62 = vmul.f32 %v324_v46, %v1166_v21 }
  0x50   :  { %v246_v63 = vadd.f32 -30.664799, %v238_v47  ;;  %v247_v0 = vadd.f32 -30.664799, %v239_v48  ;;  %v313_v1 = vadd.f32 66.801315, %v305_v49  ;;  %v319_v3 = vmul.f32 %v311_v50, %v1179_v25 }
  0x51   :  { %v248_v4 = vadd.f32 -30.664799, %v240_v51  ;;  %v249_v22 = vadd.f32 -30.664799, %v241_v52  ;;  %v314_v27 = vadd.f32 66.801315, %v306_v54  ;;  %v251_v29 = vmul.f32 %v243_v53, %v1156_v18 }
  0x52   :  { %v326_v30 = vadd.f32 -13.280682, %v318_v55  ;;  %v333_v32 = vmul.f32 %v325_v57, %v1171_v23  ;;  %981 = vrcp.f32 %v1253_v58  ;;  %v250_v33 = vadd.f32 -30.664799, %v242_v56 }
  0x53   :  { %v252_v34 = vmul.f32 %v244_v59, %v1166_v21  ;;  %v320_v35 = vmul.f32 %v312_v61, %v1183_v26  ;;  %v1262_v36 = vadd.f32 1.0, %v332_v62  ;;  %v253_v37 = vmul.f32 %v245_v60, %v1171_v23 }
  0x54   :  { %v254_v38 = vmul.f32 %v246_v63, %v1175_v24  ;;  %v321_v39 = vmul.f32 %v313_v1, %v1188_v28  ;;  %v327_v40 = vadd.f32 -13.280682, %v319_v3  ;;  %v255_v18 = vmul.f32 %v247_v0, %v1179_v25 }
  0x55   :  { %v256_v41 = vmul.f32 %v248_v4, %v1183_v26  ;;  %v322_v42 = vmul.f32 %v314_v27, %v1194_v31  ;;  %v257_v43 = vmul.f32 %v249_v22, %v1188_v28  ;;  %v259_v21 = vadd.f32 2.5066283, %v251_v29 }
  0x56   :  { %v334_v44 = vmul.f32 %v326_v30, %v1175_v24  ;;  %v1272_v45 = vadd.f32 1.0, %v333_v32  ;;  %v258_v23 = vmul.f32 %v250_v33, %v1194_v31  ;;  %v260_v46 = vadd.f32 2.5066283, %v252_v34 }
  0x57   :  { %v328_v47 = vadd.f32 -13.280682, %v320_v35  ;;  %983 = vrcp.f32 %v1262_v36  ;;  %v261_v49 = vadd.f32 2.5066283, %v253_v37  ;;  %v262_v50 = vadd.f32 2.5066283, %v254_v38 }
  0x58   :  { %v1276_v48 = vpop.eup %981  ;;  %v329_v51 = vadd.f32 -13.280682, %v321_v39  ;;  %v335_v52 = vmul.f32 %v327_v40, %v1179_v25  ;;  %v263_v53 = vadd.f32 2.5066283, %v255_v18  ;;  %v264_v54 = vadd.f32 2.5066283, %v256_v41 }
  0x59   :  { %v330_v56 = vadd.f32 -13.280682, %v322_v42  ;;  %v265_v55 = vadd.f32 2.5066283, %v257_v43  ;;  %v1279_v24 = vadd.f32 1.0, %v334_v44  ;;  %985 = vrcp.f32 %v1272_v45 }
  0x5a   :  { %v266_v57 = vadd.f32 2.5066283, %v258_v23  ;;  %v336_v59 = vmul.f32 %v328_v47, %v1183_v26  ;;  %v1284_v60 = vmul.f32 %v1125_v6, %v259_v21  ;;  %v356_v61 = vmul.f32 %v1276_v48, %v1253_v58 }
  0x5b   :  { %v337_v62 = vmul.f32 %v329_v51, %v1188_v28  ;;  %v1289_v25 = vadd.f32 1.0, %v335_v52  ;;  %v1292_v63 = vmul.f32 %v1136_v11, %v260_v46  ;;  %v1295_v0 = vmul.f32 %v1141_v13, %v261_v49 }
  0x5c   :  { %v338_v26 = vmul.f32 %v330_v56, %v1194_v31  ;;  %v1301_v6 = vmul.f32 %v1144_v14, %v262_v50  ;;  %v1304_v3 = vmul.f32 %v1149_v16, %v263_v53  ;;  %v1307_v28 = vmul.f32 %v1152_v17, %v264_v54 }
  0x5d   :  { %v1297_v1 = vpop.eup %983  ;;  %v1310_v4 = vmul.f32 %v1159_v19, %v265_v55  ;;  %v366_v11 = vand.u32 2147483648, %v1253_v58  ;;  %v381_v13 = vand.u32 2147483648, %v1262_v36  ;;  %987 = vrcp.f32 %v1279_v24 }
  0x5e   :  { %v1315_v22 = vadd.f32 1.0, %v336_v59  ;;  %v1318_v14 = vmul.f32 %v1162_v20, %v266_v57  ;;  %v357_v31 = vsub.f32 1.0, %v356_v61  ;;  %v396_v16 = vand.u32 2147483648, %v1272_v45 }
  0x5f   :  { %v1321_v27 = vpop.eup %985  ;;  %v1323_v17 = vadd.f32 1.0, %v337_v62  ;;  %v371_v19 = vmul.f32 %v1297_v1, %v1262_v36  ;;  %v411_v29 = vand.u32 2147483648, %v1279_v24  ;;  %989 = vrcp.f32 %v1289_v25 }
  0x60   :  { %2174 = vst [vmem:[#allocation18_spill] sm:$0xff] %v1318_v14  ;;  %v1329_v30 = vadd.f32 1.0, %v338_v26  ;;  %vm360_vm0 = vweird.f32 %v1253_v58  ;;  %v364_v20 = vand.u32 2147483647, %v1253_v58  ;;  %v379_v32 = vand.u32 2147483647, %v1262_v36 }
  0x61   :  { %v1334_v33 = vor.u32 1.1754944e-38, %v366_v11  ;;  %v1336_v34 = vor.u32 1.1754944e-38, %v381_v13  ;;  %v394_v35 = vand.u32 2147483647, %v1272_v45  ;;  %v409_v37 = vand.u32 2147483647, %v1279_v24 }
  0x62   :  { %v358_v38 = vmul.f32 %v1276_v48, %v357_v31  ;;  %vm361_vm1 = vweird.f32 %v1276_v48  ;;  %vm375_vm2 = vweird.f32 %v1262_v36  ;;  %v386_v39 = vmul.f32 %v1321_v27, %v1272_v45 }
  0x63   :  { %v1345_v40 = vor.u32 1.1754944e-38, %v396_v16  ;;  %v1347_v18 = vpop.eup %987  ;;  %v372_v41 = vsub.f32 1.0, %v371_v19  ;;  %v1349_v42 = vor.u32 1.1754944e-38, %v411_v29  ;;  %991 = vrcp.f32 %v1315_v22  ;;  %vm1384_vm6 = vmor %vm360_vm0, %vm361_vm1 }
  0x64   :  { %vm1353_vm3 = vcmp.eq.f32.partialorder %v364_v20, 8.507059e+37  ;;  %v426_v44 = vand.u32 2147483648, %v1289_v25  ;;  %993 = vrcp.f32 %v1323_v17  ;;  %v475_v23 = vsub.f32 1.0, %v1120_v2 }
  0x65   :  { %v476_v46 = vsub.f32 1.0, %v1122_v5  ;;  %v1361_v47 = vpop.eup %989  ;;  %vm376_vm4 = vweird.f32 %v1297_v1  ;;  %vm390_vm5 = vweird.f32 %v1272_v45  ;;  %v477_v50 = vsub.f32 1.0, %v1127_v7 }
  0x66   :  { %v478_v51 = vsub.f32 1.0, %v1129_v8  ;;  %v359_v52 = vadd.f32 %v1276_v48, %v358_v38  ;;  %v387_v53 = vsub.f32 1.0, %v386_v39  ;;  %v401_v54 = vmul.f32 %v1347_v18, %v1279_v24  ;;  %vm1433_vm10 = vmor %vm375_vm2, %vm376_vm4 }
  0x67   :  { %v479_v56 = vsub.f32 1.0, %v1131_v9  ;;  %v373_v55 = vmul.f32 %v1297_v1, %v372_v41  ;;  %v480_v57 = vsub.f32 1.0, %v1133_v10  ;;  %v1375_v59 = vmin.f32 %v1120_v2, %v475_v23 }
  0x68   :  { %v1378_v61 = vmin.f32 %v1122_v5, %v476_v46  ;;  %vm1388_vm7 = vcmp.eq.f32.partialorder %v379_v32, 8.507059e+37  ;;  %vm391_vm8 = vweird.f32 %v1321_v27  ;;  %vm405_vm9 = vweird.f32 %v1279_v24 }
  0x69   :  { %2177 = vst [vmem:[#allocation19_spill] sm:$0xff] %v1375_v59  ;;  %v416_v11 = vmul.f32 %v1361_v47, %v1289_v25  ;;  %v481_v13 = vsub.f32 1.0, %v1138_v12  ;;  %v1398_v31 = vmin.f32 %v1127_v7, %v477_v50  ;;  %v1400_v58 = vpop.eup %991  ;;  %v441_v16 = vand.u32 2147483648, %v1315_v22  ;;  %vm1473_vm0 = vmor %vm390_vm5, %vm391_vm8 }
  0x6a   :  { %2178 = vst [vmem:[#allocation20_spill] sm:$0xff] %v1378_v61  ;;  %995 = vrcp.f32 %v1329_v30  ;;  %v482_v19 = vsub.f32 1.0, %v1146_v15  ;;  %v1406_v29 = vmin.f32 %v1129_v8, %v478_v51  ;;  %v1408_v20 = vpop.eup %993  ;;  %v388_v32 = vmul.f32 %v1321_v27, %v387_v53 }
  0x6b   :  { %2183 = vst [vmem:[#allocation21_spill] sm:$0xff] %v1398_v31  ;;  %v402_v38 = vsub.f32 1.0, %v401_v54  ;;  %v1412_v39 = vmin.f32 %v1131_v9, %v479_v56  ;;  %997 = vlog2.f32 %v1375_v59  ;;  %v363_v41 = vsel %vm1384_vm6, %v1276_v48, %v359_v52 }
  0x6c   :  { %2184 = vst [vmem:[#allocation22_spill] sm:$0xff] %v1406_v29  ;;  %v374_v23 = vadd.f32 %v1297_v1, %v373_v55  ;;  %v1420_v46 = vmin.f32 %v1133_v10, %v480_v57  ;;  %999 = vlog2.f32 %v1378_v61  ;;  %v417_v50 = vsub.f32 1.0, %v416_v11 }
  0x6d   :  { %2185 = vst [vmem:[#allocation23_spill] sm:$0xff] %v1412_v39  ;;  %v431_v51 = vmul.f32 %v1400_v58, %v1315_v22  ;;  %v1426_v53 = vmin.f32 %v1138_v12, %v481_v13  ;;  %1001 = vlog2.f32 %v1398_v31  ;;  %vm420_vm11 = vweird.f32 %v1289_v25 }
  0x6e   :  { %2186 = vst [vmem:[#allocation24_spill] sm:$0xff] %v1420_v46  ;;  %v1438_v52 = vor.u32 1.1754944e-38, %v426_v44  ;;  %v446_v54 = vmul.f32 %v1408_v20, %v1323_v17  ;;  %v1443_v56 = vmin.f32 %v1146_v15, %v482_v19  ;;  %1003 = vlog2.f32 %v1406_v29 }
  0x6f   :  { %2187 = vst [vmem:[#allocation25_spill] sm:$0xff] %v1426_v53  ;;  %v403_v55 = vmul.f32 %v1347_v18, %v402_v38  ;;  %vm406_vm12 = vweird.f32 %v1347_v18  ;;  %vm421_vm13 = vweird.f32 %v1361_v47  ;;  %vm435_vm14 = vweird.f32 %v1315_v22 }
  0x70   :  { %2190 = vst [vmem:[#allocation26_spill] sm:$0xff] %v1443_v56  ;;  %1005 = vlog2.f32 %v1412_v39  ;;  %v1451_v36 = vpop.eup %995  ;;  %v368_v44 = vsel %vm1353_vm3, %v1334_v33, %v363_v41  ;;  %v389_v57 = vadd.f32 %v1321_v27, %v388_v32  ;;  %vm1459_vm15 = vcmp.eq.f32.partialorder %v394_v35, 8.507059e+37  ;;  %vm1504_vm4 = vmor %vm405_vm9, %vm406_vm12 }
  0x71   :  { %v1463_v11 = vor.u32 1.1754944e-38, %v441_v16  ;;  %1007 = vlog2.f32 %v1420_v46  ;;  %v998_v13 = vpop.eup %997  ;;  %v378_v19 = vsel %vm1433_vm10, %v1297_v1, %v374_v23  ;;  %vm1479_vm1 = vcmp.eq.f32.partialorder %v409_v37, 8.507059e+37  ;;  %vm1535_vm6 = vmor %vm420_vm11, %vm421_vm13 }
  0x72   :  { %v418_v21 = vmul.f32 %v1361_v47, %v417_v50  ;;  %v432_v16 = vsub.f32 1.0, %v431_v51  ;;  %1009 = vlog2.f32 %v1426_v53  ;;  %v1000_v1 = vpop.eup %999  ;;  %v447_v32 = vsub.f32 1.0, %v446_v54 }
  0x73   :  { %vm450_vm2 = vweird.f32 %v1323_v17  ;;  %v492_v45 = vmul.f32 0.6931472, %v998_v13  ;;  %1011 = vlog2.f32 %v1443_v56  ;;  %v1002_v38 = vpop.eup %1001  ;;  %v1488_v41 = vmul.f32 %v368_v44, %v1284_v60 }
  0x74   :  { %v404_v37 = vadd.f32 %v1347_v18, %v403_v55  ;;  %vm436_vm3 = vweird.f32 %v1400_v58  ;;  %v494_v23 = vmul.f32 0.6931472, %v1000_v1  ;;  %v1004_v50 = vpop.eup %1003  ;;  %v1495_v51 = vsel %vm1388_vm7, %v1336_v34, %v378_v19 }
  0x75   :  { %2197 = vst [vmem:[#allocation27_spill] sm:$0xff] %v1488_v41  ;;  %v393_v48 = vsel %vm1473_vm0, %v1321_v27, %v389_v57  ;;  %v496_v54 = vmul.f32 0.6931472, %v1002_v38  ;;  %v1508_v55 = vmul.f32 -2.0, %v492_v45  ;;  %v1511_v26 = vadd.f32 %v1361_v47, %v418_v21  ;;  %vm1549_vm7 = vmor %vm435_vm14, %vm436_vm3 }
  0x76   :  { %v1006_v44 = vpop.eup %1005  ;;  %v433_v34 = vmul.f32 %v1400_v58, %v432_v16  ;;  %v498_v13 = vmul.f32 0.6931472, %v1004_v50  ;;  %v1514_v19 = vmul.f32 -2.0, %v494_v23  ;;  %v448_v57 = vmul.f32 %v1408_v20, %v447_v32 }
  0x77   :  { %v1008_v27 = vpop.eup %1007  ;;  %v500_v24 = vmul.f32 0.6931472, %v1006_v44  ;;  %v1517_v33 = vmul.f32 -2.0, %v496_v54  ;;  %1013 = vrsqrt.f32 %v1508_v55  ;;  %v408_v45 = vsel %vm1504_vm4, %v1347_v18, %v404_v37 }
  0x78   :  { %v1010_v1 = vpop.eup %1009  ;;  %v461_v21 = vmul.f32 %v1451_v36, %v1329_v30  ;;  %v502_v16 = vmul.f32 0.6931472, %v1008_v27  ;;  %v1525_v38 = vmul.f32 -2.0, %v498_v13  ;;  %vm451_vm5 = vweird.f32 %v1408_v20 }
  0x79   :  { %v1012_v23 = vpop.eup %1011  ;;  %v504_v32 = vmul.f32 0.6931472, %v1010_v1  ;;  %v1528_v50 = vmul.f32 -2.0, %v500_v24  ;;  %1015 = vrsqrt.f32 %v1514_v19  ;;  %v1540_v37 = vadd.f32 %v1400_v58, %v433_v34  ;;  %vm1569_vm8 = vmor %vm450_vm2, %vm451_vm5 }
  0x7a   :  { %v456_v60 = vand.u32 2147483648, %v1323_v17  ;;  %v506_v54 = vmul.f32 0.6931472, %v1012_v23  ;;  %v1543_v44 = vmul.f32 -2.0, %v502_v16  ;;  %v1554_v27 = vadd.f32 %v1408_v20, %v448_v57 }
  0x7b   :  { %v471_v24 = vand.u32 2147483648, %v1329_v30  ;;  %v1557_v34 = vmul.f32 -2.0, %v504_v32  ;;  %1017 = vrsqrt.f32 %v1517_v33  ;;  %v1563_v1 = vsel %vm1459_vm15, %v1345_v40, %v393_v48 }
  0x7c   :  { %v462_v23 = vsub.f32 1.0, %v461_v21  ;;  %1019 = vrsqrt.f32 %v1525_v38  ;;  %v1578_v62 = vsel %vm1479_vm1, %v1349_v42, %v408_v45  ;;  %v1584_v48 = vmul.f32 -2.0, %v506_v54 }
  0x7d   :  { %v1014_v32 = vpop.eup %1013  ;;  %1021 = vrsqrt.f32 %v1528_v50  ;;  %v1591_v57 = vor.u32 1.1754944e-38, %v456_v60  ;;  %v1600_v40 = vor.u32 1.1754944e-38, %v471_v24  ;;  %vm522_vm9 = vcmp.eq.f32.partialorder %v1508_v55, inf }
  0x7e   :  { %v516_v35 = vmul.f32 %v1014_v32, %v1508_v55  ;;  %1023 = vrsqrt.f32 %v1543_v44  ;;  %v1604_v21 = vmul.f32 %v1451_v36, %v462_v23  ;;  %vm524_vm10 = vcmp.eq.f32.partialorder %v1508_v55, 0.0 }
  0x7f   :  { %v1016_v42 = vpop.eup %1015  ;;  %1025 = vrsqrt.f32 %v1557_v34  ;;  %v525_v56 = vand.u32 2147483648, %v1508_v55  ;;  %vm534_vm11 = vcmp.eq.f32.partialorder %v1514_v19, inf  ;;  %vm536_vm12 = vcmp.eq.f32.partialorder %v1514_v19, 0.0 }
  0x80   :  { %v517_v60 = vmul.f32 %v1014_v32, %v516_v35  ;;  %v528_v49 = vmul.f32 %v1016_v42, %v1514_v19  ;;  %1027 = vrsqrt.f32 %v1584_v48  ;;  %v537_v23 = vand.u32 2147483648, %v1514_v19 }
  0x81   :  { %v1018_v43 = vpop.eup %1017  ;;  %vm546_vm13 = vcmp.eq.f32.partialorder %v1517_v33, inf  ;;  %vm548_vm14 = vcmp.eq.f32.partialorder %v1517_v33, 0.0  ;;  %vm558_vm15 = vcmp.eq.f32.partialorder %v1525_v38, inf  ;;  %vm560_vm0 = vcmp.eq.f32.partialorder %v1525_v38, 0.0 }
  0x82   :  { %v1020_v24 = vpop.eup %1019  ;;  %v518_v45 = vmul.f32 0.5, %v517_v60  ;;  %v529_v54 = vmul.f32 %v1016_v42, %v528_v49  ;;  %v540_v35 = vmul.f32 %v1018_v43, %v1517_v33  ;;  %vm570_vm1 = vcmp.eq.f32.partialorder %v1528_v50, inf }
  0x83   :  { %v1022_v15 = vpop.eup %1021  ;;  %v552_v41 = vmul.f32 %v1020_v24, %v1525_v38  ;;  %v585_v46 = vand.u32 2147483648, %v1543_v44  ;;  %vm572_vm2 = vcmp.eq.f32.partialorder %v1528_v50, 0.0  ;;  %vm584_vm4 = vcmp.eq.f32.partialorder %v1543_v44, 0.0 }
  0x84   :  { %v1024_v29 = vpop.eup %1023  ;;  %v519_v60 = vsub.f32 1.5, %v518_v45  ;;  %v530_v49 = vmul.f32 0.5, %v529_v54  ;;  %v541_v31 = vmul.f32 %v1018_v43, %v540_v35  ;;  %v564_v61 = vmul.f32 %v1022_v15, %v1528_v50 }
  0x85   :  { %v1026_v59 = vpop.eup %1025  ;;  %v553_v12 = vmul.f32 %v1020_v24, %v552_v41  ;;  %v576_v53 = vmul.f32 %v1024_v29, %v1543_v44  ;;  %vm596_vm3 = vcmp.eq.f32.partialorder %v1557_v34, 0.0  ;;  %vm606_vm5 = vcmp.eq.f32.partialorder %v1584_v48, inf }
  0x86   :  { %v520_v54 = vmul.f32 %v1014_v32, %v519_v60  ;;  %v531_v35 = vsub.f32 1.5, %v530_v49  ;;  %v542_v39 = vmul.f32 0.5, %v541_v31  ;;  %v565_v10 = vmul.f32 %v1022_v15, %v564_v61  ;;  %v1028_v9 = vpop.eup %1027 }
  0x87   :  { %v554_v41 = vmul.f32 0.5, %v553_v12  ;;  %v577_v8 = vmul.f32 %v1024_v29, %v576_v53  ;;  %v588_v7 = vmul.f32 %v1026_v59, %v1557_v34  ;;  %v600_v12 = vmul.f32 %v1028_v9, %v1584_v48 }
  0x88   :  { %v521_v2 = vmul.f32 %v520_v54, %v1508_v55  ;;  %v532_v45 = vmul.f32 %v1016_v42, %v531_v35  ;;  %v543_v32 = vsub.f32 1.5, %v542_v39  ;;  %v566_v60 = vmul.f32 0.5, %v565_v10 }
  0x89   :  { %v555_v61 = vsub.f32 1.5, %v554_v41  ;;  %v578_v31 = vmul.f32 0.5, %v577_v8  ;;  %v589_v49 = vmul.f32 %v1026_v59, %v588_v7  ;;  %v601_v41 = vmul.f32 %v1028_v9, %v600_v12 }
  0x8a   :  { %v523_v53 = vsel %vm522_vm9, %v1508_v55, %v521_v2  ;;  %v533_v5 = vmul.f32 %v532_v45, %v1514_v19  ;;  %v544_v14 = vmul.f32 %v1018_v43, %v543_v32  ;;  %v567_v54 = vsub.f32 1.5, %v566_v60 }
  0x8b   :  { %v1643_v10 = vsel %vm524_vm10, %v525_v56, %v523_v53  ;;  %v556_v39 = vmul.f32 %v1020_v24, %v555_v61  ;;  %v579_v42 = vsub.f32 1.5, %v578_v31  ;;  %v590_v8 = vmul.f32 0.5, %v589_v49 }
  0x8c   :  { %v535_v7 = vsel %vm534_vm11, %v1514_v19, %v533_v5  ;;  %v545_v35 = vmul.f32 %v544_v14, %v1517_v33  ;;  %v568_v2 = vmul.f32 %v1022_v15, %v567_v54  ;;  %vm608_vm9 = vcmp.eq.f32.partialorder %v1584_v48, 0.0 }
  0x8d   :  { %v1653_v43 = vsel %vm536_vm12, %v537_v23, %v535_v7  ;;  %v557_v56 = vmul.f32 %v556_v39, %v1525_v38  ;;  %v580_v55 = vmul.f32 %v1024_v29, %v579_v42  ;;  %v591_v24 = vsub.f32 1.5, %v590_v8 }
  0x8e   :  { %v547_v45 = vsel %vm546_vm13, %v1517_v33, %v545_v35  ;;  %v569_v5 = vmul.f32 %v568_v2, %v1528_v50  ;;  %v602_v32 = vmul.f32 0.5, %v601_v41  ;;  %v611_v15 = vmul.f32 -0.007784894, %v1643_v10 }
  0x8f   :  { %v2206_v14 = vand.u32 2147483648, %v1517_v33  ;;  %v559_v29 = vsel %vm558_vm15, %v1525_v38, %v557_v56  ;;  %v581_v23 = vmul.f32 %v580_v55, %v1543_v44  ;;  %v592_v60 = vmul.f32 %v1026_v59, %v591_v24 }
  0x90   :  { %v2207_v61 = vand.u32 2147483648, %v1525_v38  ;;  %v571_v49 = vsel %vm570_vm1, %v1528_v50, %v569_v5  ;;  %v603_v33 = vsub.f32 1.5, %v602_v32  ;;  %v612_v12 = vmul.f32 -0.007784894, %v1653_v43 }
  0x91   :  { %v1665_v19 = vsel %vm548_vm14, %v2206_v14, %v547_v45  ;;  %vm465_vm10 = vweird.f32 %v1329_v30  ;;  %vm466_vm11 = vweird.f32 %v1451_v36  ;;  %v2208_v53 = vand.u32 2147483648, %v1528_v50 }
  0x92   :  { %v1675_v31 = vsel %vm560_vm0, %v2207_v61, %v559_v29  ;;  %vm2209_vm12 = vcmp.eq.f32.partialorder %v1543_v44, inf  ;;  %v593_v54 = vmul.f32 %v592_v60, %v1557_v34  ;;  %v613_v39 = vmul.f32 -0.007784894, %v1665_v19 }
  0x93   :  { %v1687_v59 = vsel %vm572_vm2, %v2208_v53, %v571_v49  ;;  %v583_v38 = vsel %vm2209_vm12, %v1543_v44, %v581_v23  ;;  %v604_v8 = vmul.f32 %v1028_v9, %v603_v33  ;;  %v614_v7 = vmul.f32 -0.007784894, %v1675_v31  ;;  %vm1764_vm2 = vmor %vm465_vm10, %vm466_vm11 }
  0x94   :  { %v1696_v42 = vsel %vm584_vm4, %v585_v46, %v583_v38  ;;  %v615_v35 = vmul.f32 -0.007784894, %v1687_v59  ;;  %vm2210_vm13 = vcmp.eq.f32.partialorder %v1557_v34, inf  ;;  %v619_v41 = vadd.f32 -0.32239646, %v611_v15 }
  0x95   :  { %v595_v50 = vsel %vm2210_vm13, %v1557_v34, %v593_v54  ;;  %v616_v2 = vmul.f32 -0.007784894, %v1696_v42  ;;  %v620_v56 = vadd.f32 -0.32239646, %v612_v12  ;;  %v2211_v55 = vand.u32 2147483648, %v1557_v34 }
  0x96   :  { %v605_v9 = vmul.f32 %v604_v8, %v1584_v48  ;;  %v621_v46 = vadd.f32 -0.32239646, %v613_v39  ;;  %v622_v24 = vadd.f32 -0.32239646, %v614_v7  ;;  %v2212_v45 = vand.u32 2147483647, %v1289_v25 }
  0x97   :  { %v1708_v44 = vsel %vm596_vm3, %v2211_v55, %v595_v50  ;;  %v623_v15 = vadd.f32 -0.32239646, %v615_v35  ;;  %v624_v14 = vadd.f32 -0.32239646, %v616_v2  ;;  %v627_v29 = vmul.f32 %v619_v41, %v1643_v10 }
  0x98   :  { %vm1713_vm14 = vcmp.eq.f32.partialorder %v2212_v45, 8.507059e+37  ;;  %v617_v32 = vmul.f32 -0.007784894, %v1708_v44  ;;  %v2215_v34 = vand.u32 2147483647, %v1315_v22  ;;  %v607_v61 = vsel %vm606_vm5, %v1584_v48, %v605_v9 }
  0x99   :  { %v2218_v60 = vand.u32 2147483647, %v1323_v17  ;;  %v628_v49 = vmul.f32 %v620_v56, %v1653_v43  ;;  %v629_v33 = vmul.f32 %v621_v46, %v1665_v19  ;;  %v630_v22 = vmul.f32 %v622_v24, %v1675_v31 }
  0x9a   :  { %vm1721_vm15 = vcmp.eq.f32.partialorder %v2215_v34, 8.507059e+37  ;;  %v2221_v12 = vand.u32 2147483647, %v1329_v30  ;;  %v2224_v17 = vand.u32 2147483648, %v1584_v48  ;;  %v625_v54 = vadd.f32 -0.32239646, %v617_v32 }
  0x9b   :  { %vm1727_vm0 = vcmp.eq.f32.partialorder %v2218_v60, 8.507059e+37  ;;  %v631_v39 = vmul.f32 %v623_v15, %v1687_v59  ;;  %v632_v8 = vmul.f32 %v624_v14, %v1696_v42  ;;  %v464_v7 = vadd.f32 %v1451_v36, %v1604_v21 }
  0x9c   :  { %vm1739_vm1 = vcmp.eq.f32.partialorder %v2221_v12, 8.507059e+37  ;;  %v1747_v38 = vsel %vm608_vm9, %v2224_v17, %v607_v61  ;;  %v635_v50 = vadd.f32 -2.4007583, %v627_v29  ;;  %v636_v2 = vadd.f32 -2.4007583, %v628_v49 }
  0x9d   :  { %v618_v35 = vmul.f32 -0.007784894, %v1747_v38  ;;  %v633_v41 = vmul.f32 %v625_v54, %v1708_v44  ;;  %v637_v56 = vadd.f32 -2.4007583, %v629_v33  ;;  %v638_v55 = vadd.f32 -2.4007583, %v630_v22 }
  0x9e   :  { %v639_v9 = vadd.f32 -2.4007583, %v631_v39  ;;  %v640_v46 = vadd.f32 -2.4007583, %v632_v8  ;;  %v643_v24 = vmul.f32 %v635_v50, %v1643_v10  ;;  %v644_v45 = vmul.f32 %v636_v2, %v1653_v43 }
  0x9f   :  { %v626_v48 = vadd.f32 -0.32239646, %v618_v35  ;;  %v641_v32 = vadd.f32 -2.4007583, %v633_v41  ;;  %v645_v15 = vmul.f32 %v637_v56, %v1665_v19  ;;  %v646_v21 = vmul.f32 %v638_v55, %v1675_v31 }
  0xa0   :  { %v647_v14 = vmul.f32 %v639_v9, %v1687_v59  ;;  %v648_v60 = vmul.f32 %v640_v46, %v1696_v42  ;;  %v651_v61 = vadd.f32 -2.5497324, %v643_v24  ;;  %v652_v49 = vadd.f32 -2.5497324, %v644_v45 }
  0xa1   :  { %v634_v34 = vmul.f32 %v626_v48, %v1747_v38  ;;  %v649_v33 = vmul.f32 %v641_v32, %v1708_v44  ;;  %v653_v22 = vadd.f32 -2.5497324, %v645_v15  ;;  %v654_v12 = vadd.f32 -2.5497324, %v646_v21 }
  0xa2   :  { %v655_v17 = vadd.f32 -2.5497324, %v647_v14  ;;  %v656_v39 = vadd.f32 -2.5497324, %v648_v60  ;;  %v659_v8 = vmul.f32 %v651_v61, %v1643_v10  ;;  %v660_v30 = vmul.f32 %v652_v49, %v1653_v43 }
  0xa3   :  { %v642_v54 = vadd.f32 -2.4007583, %v634_v34  ;;  %v468_v35 = vsel %vm1764_vm2, %v1451_v36, %v464_v7  ;;  %v657_v50 = vadd.f32 -2.5497324, %v649_v33  ;;  %v661_v2 = vmul.f32 %v653_v22, %v1665_v19 }
  0xa4   :  { %v662_v41 = vmul.f32 %v654_v12, %v1675_v31  ;;  %v2227_v56 = vsel %vm1535_vm6, %v1361_v47, %v1511_v26  ;;  %v663_v48 = vmul.f32 %v655_v17, %v1687_v59  ;;  %v667_v46 = vadd.f32 4.3746643, %v659_v8 }
  0xa5   :  { %v428_v55 = vsel %vm1713_vm14, %v1438_v52, %v2227_v56  ;;  %v650_v9 = vmul.f32 %v642_v54, %v1747_v38  ;;  %v2228_v36 = vsel %vm1549_vm7, %v1400_v58, %v1540_v37  ;;  %v2229_v47 = vsel %vm1569_vm8, %v1408_v20, %v1554_v27 }
  0xa6   :  { %v443_v18 = vsel %vm1721_vm15, %v1463_v11, %v2228_v36  ;;  %v458_v52 = vsel %vm1727_vm0, %v1591_v57, %v2229_v47  ;;  %v664_v26 = vmul.f32 %v656_v39, %v1696_v42  ;;  %v668_v5 = vadd.f32 4.3746643, %v660_v30 }
  0xa7   :  { %v473_v58 = vsel %vm1739_vm1, %v1600_v40, %v468_v35  ;;  %v658_v37 = vadd.f32 -2.5497324, %v650_v9  ;;  %v665_v13 = vmul.f32 %v657_v50, %v1708_v44  ;;  %v669_v11 = vadd.f32 4.3746643, %v661_v2 }
  0xa8   :  { %v1811_v16 = vmul.f32 %v1495_v51, %v1292_v63  ;;  %v1815_v20 = vmul.f32 %v1563_v1, %v1295_v0  ;;  %v670_v27 = vadd.f32 4.3746643, %v662_v41  ;;  %v675_v57 = vmul.f32 %v667_v46, %v1643_v10  ;;  %v2230_v51 = vld [vmem:[#allocation18_spill] sm:$0xff] }
  0xa9   :  { %v1820_v23 = vmul.f32 %v1578_v62, %v1301_v6  ;;  %v1823_v40 = vmul.f32 %v428_v55, %v1304_v3  ;;  %v1826_v25 = vmul.f32 %v443_v18, %v1307_v28  ;;  %v671_v53 = vadd.f32 4.3746643, %v663_v48 }
  0xaa   :  { %v1829_v63 = vmul.f32 %v458_v52, %v1310_v4  ;;  %v1832_v0 = vmul.f32 %v473_v58, %v2230_v51  ;;  %v672_v1 = vadd.f32 4.3746643, %v664_v26  ;;  %v1835_v7 = vmul.f32 %v668_v5, %v1653_v43 }
  0xab   :  { %v666_v6 = vmul.f32 %v658_v37, %v1747_v38  ;;  %v673_v62 = vadd.f32 4.3746643, %v665_v13  ;;  %v1839_v3 = vmul.f32 %v669_v11, %v1665_v19  ;;  %v691_v28 = vmul.f32 0.007784696, %v1643_v10 }
  0xac   :  { %v1843_v24 = vmul.f32 %v670_v27, %v1675_v31  ;;  %v1845_v4 = vadd.f32 2.938164, %v675_v57  ;;  %v692_v45 = vmul.f32 0.007784696, %v1653_v43  ;;  %v693_v32 = vmul.f32 0.007784696, %v1665_v19 }
  0xad   :  { %v1850_v15 = vmul.f32 %v671_v53, %v1687_v59  ;;  %v694_v21 = vmul.f32 0.007784696, %v1675_v31  ;;  %v695_v14 = vmul.f32 0.007784696, %v1687_v59  ;;  %v696_v29 = vmul.f32 0.007784696, %v1696_v42 }
  0xae   :  { %v680_v34 = vmul.f32 %v672_v1, %v1696_v42  ;;  %v697_v60 = vmul.f32 0.007784696, %v1708_v44  ;;  %v698_v61 = vmul.f32 0.007784696, %v1747_v38  ;;  %v699_v49 = vadd.f32 0.32246712, %v691_v28 }
  0xaf   :  { %v674_v33 = vadd.f32 4.3746643, %v666_v6  ;;  %v681_v22 = vmul.f32 %v673_v62, %v1708_v44  ;;  %v700_v12 = vadd.f32 0.32246712, %v692_v45  ;;  %v701_v17 = vadd.f32 0.32246712, %v693_v32 }
  0xb0   :  { %v702_v54 = vadd.f32 0.32246712, %v694_v21  ;;  %v703_v39 = vadd.f32 0.32246712, %v695_v14  ;;  %v704_v8 = vadd.f32 0.32246712, %v696_v29  ;;  %v707_v30 = vmul.f32 %v699_v49, %v1643_v10 }
  0xb1   :  { %v705_v35 = vadd.f32 0.32246712, %v697_v60  ;;  %v706_v50 = vadd.f32 0.32246712, %v698_v61  ;;  %v708_v2 = vmul.f32 %v700_v12, %v1653_v43  ;;  %v709_v41 = vmul.f32 %v701_v17, %v1665_v19 }
  0xb2   :  { %v710_v56 = vmul.f32 %v702_v54, %v1675_v31  ;;  %v711_v55 = vmul.f32 %v703_v39, %v1687_v59  ;;  %v712_v9 = vmul.f32 %v704_v8, %v1696_v42  ;;  %v715_v48 = vadd.f32 2.4451342, %v707_v30 }
  0xb3   :  { %v713_v46 = vmul.f32 %v705_v35, %v1708_v44  ;;  %v714_v36 = vmul.f32 %v706_v50, %v1747_v38  ;;  %v716_v18 = vadd.f32 2.4451342, %v708_v2  ;;  %v717_v47 = vadd.f32 2.4451342, %v709_v41 }
  0xb4   :  { %v718_v52 = vadd.f32 2.4451342, %v710_v56  ;;  %v719_v26 = vadd.f32 2.4451342, %v711_v55  ;;  %v720_v5 = vadd.f32 2.4451342, %v712_v9  ;;  %v723_v58 = vmul.f32 %v715_v48, %v1643_v10 }
  0xb5   :  { %v721_v37 = vadd.f32 2.4451342, %v713_v46  ;;  %v722_v13 = vadd.f32 2.4451342, %v714_v36  ;;  %v724_v11 = vmul.f32 %v716_v18, %v1653_v43  ;;  %v725_v27 = vmul.f32 %v717_v47, %v1665_v19 }
  0xb6   :  { %v726_v57 = vmul.f32 %v718_v52, %v1675_v31  ;;  %v727_v53 = vmul.f32 %v719_v26, %v1687_v59  ;;  %v728_v51 = vmul.f32 %v720_v5, %v1696_v42  ;;  %v731_v1 = vadd.f32 3.7544086, %v723_v58 }
  0xb7   :  { %v729_v6 = vmul.f32 %v721_v37, %v1708_v44  ;;  %v730_v62 = vmul.f32 %v722_v13, %v1747_v38  ;;  %v732_v28 = vadd.f32 3.7544086, %v724_v11  ;;  %v733_v45 = vadd.f32 3.7544086, %v725_v27 }
  0xb8   :  { %v734_v32 = vadd.f32 3.7544086, %v726_v57  ;;  %v735_v21 = vadd.f32 3.7544086, %v727_v53  ;;  %v736_v14 = vadd.f32 3.7544086, %v728_v51  ;;  %v739_v29 = vmul.f32 %v731_v1, %v1643_v10 }
  0xb9   :  { %v737_v60 = vadd.f32 3.7544086, %v729_v6  ;;  %v738_v61 = vadd.f32 3.7544086, %v730_v62  ;;  %v740_v49 = vmul.f32 %v732_v28, %v1653_v43  ;;  %v741_v12 = vmul.f32 %v733_v45, %v1665_v19 }
  0xba   :  { %v682_v17 = vmul.f32 %v674_v33, %v1747_v38  ;;  %v742_v54 = vmul.f32 %v734_v32, %v1675_v31  ;;  %v743_v39 = vmul.f32 %v735_v21, %v1687_v59  ;;  %v1881_v8 = vadd.f32 1.0, %v739_v29 }
  0xbb   :  { %v1884_v30 = vadd.f32 2.938164, %v1835_v7  ;;  %v744_v35 = vmul.f32 %v736_v14, %v1696_v42  ;;  %v1887_v10 = vadd.f32 1.0, %v740_v49  ;;  %v1889_v50 = vadd.f32 1.0, %v741_v12 }
  0xbc   :  { %v1892_v43 = vadd.f32 2.938164, %v1839_v3  ;;  %v1895_v19 = vadd.f32 2.938164, %v1843_v24  ;;  %v745_v31 = vmul.f32 %v737_v60, %v1708_v44  ;;  %1029 = vrcp.f32 %v1881_v8 }
  0xbd   :  { %v1900_v59 = vadd.f32 2.938164, %v1850_v15  ;;  %v1902_v7 = vadd.f32 2.938164, %v680_v34  ;;  %v746_v42 = vmul.f32 %v738_v61, %v1747_v38  ;;  %v1905_v33 = vadd.f32 1.0, %v742_v54 }
  0xbe   :  { %v1907_v2 = vadd.f32 2.938164, %v681_v22  ;;  %v1909_v3 = vadd.f32 2.938164, %v682_v17  ;;  %v1911_v41 = vadd.f32 1.0, %v743_v39  ;;  %1031 = vrcp.f32 %v1887_v10 }
  0xbf   :  { %v1914_v44 = vadd.f32 1.0, %v744_v35  ;;  %v766_v24 = vand.u32 2147483648, %v1881_v8  ;;  %v781_v15 = vand.u32 2147483648, %v1887_v10  ;;  %1033 = vrcp.f32 %v1889_v50  ;;  %v2258_v35 = vld [vmem:[#allocation10_spill] sm:$0xff] }
  0xc0   :  { %v1919_v34 = vadd.f32 1.0, %v745_v31  ;;  %v764_v38 = vand.u32 2147483647, %v1881_v8  ;;  %v779_v22 = vand.u32 2147483647, %v1887_v10  ;;  %v796_v56 = vand.u32 2147483648, %v1889_v50 }
  0xc1   :  { %v1924_v55 = vadd.f32 1.0, %v746_v42  ;;  %vm760_vm6 = vweird.f32 %v1881_v8  ;;  %v794_v9 = vand.u32 2147483647, %v1889_v50  ;;  %1035 = vrcp.f32 %v1905_v33 }
  0xc2   :  { %v1929_v48 = vpop.eup %1029  ;;  %vm775_vm7 = vweird.f32 %v1887_v10  ;;  %v809_v46 = vand.u32 2147483647, %v1905_v33  ;;  %v811_v36 = vand.u32 2147483648, %v1905_v33  ;;  %1037 = vrcp.f32 %v1911_v41 }
  0xc3   :  { %v756_v18 = vmul.f32 %v1929_v48, %v1881_v8  ;;  %v1937_v47 = vor.u32 1.1754944e-38, %v766_v24  ;;  %v1939_v52 = vor.u32 1.1754944e-38, %v781_v15  ;;  %vm790_vm8 = vweird.f32 %v1889_v50 }
  0xc4   :  { %v1032_v26 = vpop.eup %1031  ;;  %vm1942_vm3 = vcmp.eq.f32.partialorder %v764_v38, 8.507059e+37  ;;  %vm1946_vm4 = vcmp.eq.f32.partialorder %v779_v22, 8.507059e+37  ;;  %v797_v37 = vor.u32 1.1754944e-38, %v796_v56  ;;  %vm805_vm5 = vweird.f32 %v1905_v33 }
  0xc5   :  { %v824_v13 = vand.u32 2147483647, %v1911_v41  ;;  %1039 = vrcp.f32 %v1914_v44  ;;  %v1034_v11 = vpop.eup %1033  ;;  %v757_v27 = vsub.f32 1.0, %v756_v18  ;;  %vm761_vm9 = vweird.f32 %v1929_v48 }
  0xc6   :  { %v771_v57 = vmul.f32 %v1032_v26, %v1887_v10  ;;  %vm1955_vm10 = vcmp.eq.f32.partialorder %v794_v9, 8.507059e+37  ;;  %vm820_vm11 = vweird.f32 %v1911_v41  ;;  %vm776_vm12 = vweird.f32 %v1032_v26  ;;  %vm1979_vm1 = vmor %vm760_vm6, %vm761_vm9 }
  0xc7   :  { %v786_v51 = vmul.f32 %v1034_v11, %v1889_v50  ;;  %vm1961_vm13 = vcmp.eq.f32.partialorder %v809_v46, 8.507059e+37  ;;  %v812_v6 = vor.u32 1.1754944e-38, %v811_v36  ;;  %v826_v62 = vand.u32 2147483648, %v1911_v41  ;;  %v1036_v28 = vpop.eup %1035  ;;  %vm1988_vm2 = vmor %vm775_vm7, %vm776_vm12  ;;  %v2265_v50 = vld [vmem:[#allocation15_spill] sm:$0xff] }
  0xc8   :  { %v758_v45 = vmul.f32 %v1929_v48, %v757_v27  ;;  %v772_v32 = vsub.f32 1.0, %v771_v57  ;;  %vm791_vm14 = vweird.f32 %v1034_v11  ;;  %v1038_v21 = vpop.eup %1037  ;;  %v801_v29 = vmul.f32 %v1036_v28, %v1905_v33 }
  0xc9   :  { %v787_v14 = vsub.f32 1.0, %v786_v51  ;;  %vm1969_vm0 = vcmp.eq.f32.partialorder %v824_v13, 8.507059e+37  ;;  %1041 = vrcp.f32 %v1919_v34  ;;  %v816_v17 = vmul.f32 %v1038_v21, %v1911_v41  ;;  %vm1996_vm6 = vmor %vm790_vm8, %vm791_vm14 }
  0xca   :  { %v759_v61 = vadd.f32 %v1929_v48, %v758_v45  ;;  %v773_v12 = vmul.f32 %v1032_v26, %v772_v32  ;;  %v839_v54 = vand.u32 2147483647, %v1914_v44  ;;  %v802_v42 = vsub.f32 1.0, %v801_v29  ;;  %v2270_v29 = vld [vmem:[#allocation22_spill] sm:$0xff] }
  0xcb   :  { %v1040_v39 = vpop.eup %1039  ;;  %v788_v31 = vmul.f32 %v1034_v11, %v787_v14  ;;  %vm806_vm15 = vweird.f32 %v1036_v28  ;;  %v841_v8 = vand.u32 2147483648, %v1914_v44  ;;  %v817_v38 = vsub.f32 1.0, %v816_v17 }
  0xcc   :  { %v774_v24 = vadd.f32 %v1032_v26, %v773_v12  ;;  %vm821_vm9 = vweird.f32 %v1038_v21  ;;  %v831_v10 = vmul.f32 %v1040_v39, %v1914_v44  ;;  %v763_v22 = vsel %vm1979_vm1, %v1929_v48, %v759_v61  ;;  %vm2008_vm7 = vmor %vm805_vm5, %vm806_vm15 }
  0xcd   :  { %v789_v56 = vadd.f32 %v1034_v11, %v788_v31  ;;  %v803_v9 = vmul.f32 %v1036_v28, %v802_v42  ;;  %v827_v46 = vor.u32 1.1754944e-38, %v826_v62  ;;  %v818_v18 = vmul.f32 %v1038_v21, %v817_v38  ;;  %vm2016_vm12 = vmor %vm820_vm11, %vm821_vm9  ;;  %v2261_v31 = vld [vmem:[#allocation13_spill] sm:$0xff] }
  0xce   :  { %v778_v36 = vsel %vm1988_vm2, %v1032_v26, %v774_v24  ;;  %v832_v13 = vsub.f32 1.0, %v831_v10  ;;  %vm836_vm8 = vweird.f32 %v1040_v39  ;;  %vm2020_vm14 = vcmp.eq.f32.partialorder %v839_v54, 8.507059e+37  ;;  %v2264_v24 = vld [vmem:[#allocation14_spill] sm:$0xff] }
  0xcf   :  { %v1042_v27 = vpop.eup %1041  ;;  %v793_v57 = vsel %vm1996_vm6, %v1034_v11, %v789_v56  ;;  %v804_v48 = vadd.f32 %v1036_v28, %v803_v9  ;;  %v842_v26 = vor.u32 1.1754944e-38, %v841_v8  ;;  %v768_v62 = vsel %vm1942_vm3, %v1937_v47, %v763_v22 }
  0xd0   :  { %v783_v11 = vsel %vm1946_vm4, %v1939_v52, %v778_v36  ;;  %v819_v45 = vadd.f32 %v1038_v21, %v818_v18  ;;  %v833_v32 = vmul.f32 %v1040_v39, %v832_v13  ;;  %v798_v41 = vsel %vm1955_vm10, %v797_v37, %v793_v57  ;;  %v2266_v18 = vld [vmem:[#allocation16_spill] sm:$0xff] }
  0xd1   :  { %v808_v14 = vsel %vm2008_vm7, %v1036_v28, %v804_v48  ;;  %vm2253_vm5 = vweird.f32 %v1914_v44  ;;  %v846_v47 = vmul.f32 %v1042_v27, %v1919_v34  ;;  %vm850_vm3 = vweird.f32 %v1919_v34 }
  0xd2   :  { %vm2036_vm11 = vmor %vm2253_vm5, %vm836_vm8  ;;  %v813_v52 = vsel %vm1961_vm13, %v812_v6, %v808_v14  ;;  %v823_v5 = vsel %vm2016_vm12, %v1038_v21, %v819_v45  ;;  %v834_v58 = vadd.f32 %v1040_v39, %v833_v32  ;;  %vm851_vm4 = vweird.f32 %v1042_v27  ;;  %v2269_v45 = vld [vmem:[#allocation21_spill] sm:$0xff] }
  0xd3   :  { %v828_v37 = vsel %vm1969_vm0, %v827_v46, %v823_v5  ;;  %v847_v44 = vsub.f32 1.0, %v846_v47  ;;  %v854_v53 = vand.u32 2147483647, %v1919_v34  ;;  %v856_v28 = vand.u32 2147483648, %v1919_v34  ;;  %vm2062_vm10 = vmor %vm850_vm3, %vm851_vm4  ;;  %v2260_v34 = vld [vmem:[#allocation12_spill] sm:$0xff] }
  0xd4   :  { %v769_v61 = vmul.f32 %v768_v62, %v1845_v4  ;;  %v784_v49 = vmul.f32 %v783_v11, %v1884_v30  ;;  %v838_v1 = vsel %vm2036_vm11, %v1040_v39, %v834_v58  ;;  %1043 = vrcp.f32 %v1924_v55  ;;  %v2267_v62 = vld [vmem:[#allocation19_spill] sm:$0xff]  ;;  %v2268_v11 = vld [vmem:[#allocation20_spill] sm:$0xff]  ;;  %v2274_v58 = vld [vmem:[#allocation25_spill] sm:$0xff] }
  0xd5   :  { %v799_v6 = vmul.f32 %v798_v41, %v1892_v43  ;;  %v814_v21 = vmul.f32 %v813_v52, %v1895_v19  ;;  %v843_v60 = vsel %vm2020_vm14, %v842_v26, %v838_v1  ;;  %v848_v12 = vmul.f32 %v1042_v27, %v847_v44  ;;  %v2273_v5 = vld [vmem:[#allocation24_spill] sm:$0xff] }
  0xd6   :  { %v829_v17 = vmul.f32 %v828_v37, %v1900_v59  ;;  %v857_v30 = vor.u32 1.1754944e-38, %v856_v28  ;;  %v869_v54 = vand.u32 2147483647, %v1924_v55  ;;  %v871_v39 = vand.u32 2147483648, %v1924_v55  ;;  %v2259_v59 = vld [vmem:[#allocation11_spill] sm:$0xff] }
  0xd7   :  { %v844_v43 = vmul.f32 %v843_v60, %v1902_v7  ;;  %v849_v19 = vadd.f32 %v1042_v27, %v848_v12  ;;  %vm855_vm13 = vcmp.eq.f32.partialorder %v854_v53, 8.507059e+37  ;;  %vm865_vm15 = vweird.f32 %v1924_v55  ;;  %v2275_v37 = vld [vmem:[#allocation27_spill] sm:$0xff] }
  0xd8   :  { %vm875_vm0 = vcmp.lt.f32.partialorder %v2258_v35, 0.5  ;;  %vm876_vm1 = vcmp.lt.f32.partialorder %v2259_v59, 0.5  ;;  %vm877_vm2 = vcmp.lt.f32.partialorder %v2260_v34, 0.5  ;;  %vm878_vm6 = vcmp.lt.f32.partialorder %v2261_v31, 0.5 }
  0xd9   :  { %v853_v42 = vsel %vm2062_vm10, %v1042_v27, %v849_v19  ;;  %vm2076_vm9 = vcmp.eq.f32.partialorder %v869_v54, 8.507059e+37  ;;  %v872_v7 = vor.u32 1.1754944e-38, %v871_v39  ;;  %vm879_vm7 = vcmp.lt.f32.partialorder %v2264_v24, 0.5  ;;  %v915_v19 = vld [vmem:[#allocation4] sm:$0xff] }
  0xda   :  { %v883_v15 = vsub.f32 0.0, %v769_v61  ;;  %v1044_v38 = vpop.eup %1043  ;;  %v858_v10 = vsel %vm855_vm13, %v857_v30, %v853_v42  ;;  %v884_v22 = vsub.f32 0.0, %v784_v49  ;;  %v885_v56 = vsub.f32 0.0, %v799_v6  ;;  %v2277_v30 = vld [vmem:[#allocation17_spill] sm:$0xff] }
  0xdb   :  { %v886_v9 = vsub.f32 0.0, %v814_v21  ;;  %v859_v46 = vmul.f32 %v858_v10, %v1907_v2  ;;  %v861_v36 = vmul.f32 %v1044_v38, %v1924_v55  ;;  %vm880_vm8 = vcmp.lt.f32.partialorder %v2265_v50, 0.5 }
  0xdc   :  { %vm881_vm12 = vcmp.lt.f32.partialorder %v2266_v18, 0.5  ;;  %vm866_vm14 = vweird.f32 %v1044_v38  ;;  %v887_v13 = vsub.f32 0.0, %v829_v17  ;;  %v888_v27 = vsub.f32 0.0, %v844_v43 }
  0xdd   :  { %v891_v57 = vsel %vm875_vm0, %v769_v61, %v883_v15  ;;  %v862_v48 = vsub.f32 1.0, %v861_v36  ;;  %v889_v51 = vsub.f32 0.0, %v859_v46  ;;  %v892_v33 = vsel %vm876_vm1, %v784_v49, %v884_v22  ;;  %vm2100_vm10 = vmor %vm865_vm15, %vm866_vm14  ;;  %v2276_v49 = vld [vmem:[#allocation23_spill] sm:$0xff] }
  0xde   :  { %v893_v2 = vsel %vm877_vm2, %v799_v6, %v885_v56  ;;  %v894_v26 = vsel %vm878_vm6, %v814_v21, %v886_v9  ;;  %vm899_vm5 = vcmp.lt.f32.partialorder %v2267_v62, 0.02425  ;;  %vm900_vm11 = vcmp.lt.f32.partialorder %v2268_v11, 0.02425  ;;  %v916_v56 = vld [vmem:[#allocation4 + $0x8] sm:$0xff] }
  0xdf   :  { %vm901_vm3 = vcmp.lt.f32.partialorder %v2269_v45, 0.02425  ;;  %v863_v32 = vmul.f32 %v1044_v38, %v862_v48  ;;  %v896_v41 = vsel %vm880_vm8, %v844_v43, %v888_v27  ;;  %v897_v14 = vsel %vm881_vm12, %v859_v46, %v889_v51 }
  0xe0   :  { %vm902_vm4 = vcmp.lt.f32.partialorder %v2270_v29, 0.02425  ;;  %v895_v52 = vsel %vm879_vm7, %v829_v17, %v887_v13  ;;  %vm904_vm13 = vcmp.lt.f32.partialorder %v2273_v5, 0.02425  ;;  %vm905_vm0 = vcmp.lt.f32.partialorder %v2274_v58, 0.02425 }
  0xe1   :  { %v907_v44 = vsel %vm899_vm5, %v891_v57, %v2275_v37  ;;  %v864_v53 = vadd.f32 %v1044_v38, %v863_v32  ;;  %v908_v28 = vsel %vm900_vm11, %v892_v33, %v1811_v16  ;;  %v909_v61 = vsel %vm901_vm3, %v893_v2, %v1815_v20  ;;  %v2278_v20 = vld [vmem:[#allocation26_spill] sm:$0xff] }
  0xe2   :  { %v910_v55 = vsel %vm902_vm4, %v894_v26, %v1820_v23  ;;  %vm903_vm15 = vcmp.lt.f32.partialorder %v2276_v49, 0.02425  ;;  %v912_v1 = vsel %vm904_vm13, %v896_v41, %v1826_v25  ;;  %v913_v6 = vsel %vm905_vm0, %v897_v14, %v1829_v63 }
  0xe3   :  { %v917_v21 = vmul.f32 0.1, %v907_v44  ;;  %v868_v60 = vsel %vm2100_vm10, %v1044_v38, %v864_v53  ;;  %v918_v12 = vmul.f32 0.1, %v908_v28  ;;  %v919_v17 = vmul.f32 0.1, %v909_v61 }
  0xe4   :  { %v920_v4 = vmul.f32 0.1, %v910_v55  ;;  %v873_v16 = vsel %vm2076_vm9, %v872_v7, %v868_v60  ;;  %vm882_vm1 = vcmp.lt.f32.partialorder %v2277_v30, 0.5  ;;  %vm906_vm2 = vcmp.lt.f32.partialorder %v2278_v20, 0.02425 }
  0xe5   :  { %v922_v23 = vmul.f32 0.1, %v912_v1  ;;  %v874_v54 = vmul.f32 %v873_v16, %v1909_v3  ;;  %v933_v25 = vrot.slane %v918_v12, 6  ;;  %v934_v39 = vrot.slane %v919_v17, 4 }
  0xe6   :  { %v935_v63 = vrot.slane %v920_v4, 2  ;;  %v911_v43 = vsel %vm903_vm15, %v895_v52, %v1823_v40  ;;  %v923_v35 = vmul.f32 0.1, %v913_v6  ;;  %vm939_vm6 = vcmask 1041408  }
  0xe7   :  { %vm941_vm7 = vcmask 1045508   ;;  %v890_v59 = vsub.f32 0.0, %v874_v54  ;;  %v940_v34 = vsel %vm939_vm6, %v917_v21, %v933_v25  ;;  %vm943_vm9 = vcmask 1043456  }
  0xe8   :  { %v942_v31 = vsel %vm941_vm7, %v934_v39, %v935_v63  ;;  %v921_v8 = vmul.f32 0.1, %v911_v43  ;;  %v936_v7 = vrot.slane %v922_v23, 6  ;;  %v937_v38 = vrot.slane %v923_v35, 4 }
  0xe9   :  { %v944_v42 = vsel %vm943_vm9, %v940_v34, %v942_v31  ;;  %v898_v3 = vsel %vm882_vm1, %v874_v54, %v890_v59 }
  0xea   :  { %v950_v24 = vadd.f32 %v944_v42, %v915_v19  ;;  %v914_v40 = vsel %vm906_vm2, %v898_v3, %v1832_v0  ;;  %v945_v22 = vsel %vm939_vm6, %v921_v8, %v936_v7 }
  0xeb   :  { %v924_v15 = vmul.f32 0.1, %v914_v40 }
  0xec   :  { %952 = vst [vmem:[#allocation7] sm:$0xff] %v950_v24 }
  0xed   :  { %v938_v10 = vrot.slane %v924_v15, 2 }
  0xef   :  { %v946_v9 = vsel %vm941_vm7, %v937_v38, %v938_v10 }
  0xf0   :  { %v947_v46 = vsel %vm943_vm9, %v945_v22, %v946_v9 }
  0xf1   :  { %v951_v36 = vadd.f32 %v947_v46, %v916_v56 }
  0xf3   :  { %953 = vst [vmem:[#allocation7 + $0x8] sm:$0xff] %v951_v36 }
  0xf4   :  { %964 = dma.vmem_to_hbm [thread:$0]  %s960_s1, 256, %s962_s19, [#allocation6]  }
  0xf5   :  { %1095 = dma.done.wait [#allocation6], 256  }
  0xf6   :  { %1096 = vsyncadd [#allocation6], 4294967040 }
  0xf7   :  { %969 = vsyncpa [#allocation5], 1 }
  0xf8   :  { %970 = vsyncpa [#allocation6], 1 }

</bundles_post_ra>
